<compile_context>
chip_gen: v6e
topology: v6e:2x2x1
jax: 0.10.0
libtpu: 0.0.40
codegen_flags: <defaults>
</compile_context>

<pallas_src>
import jax
import jax.numpy as jnp
from jax import lax
from jax.experimental import pallas as pl
from jax.experimental.pallas import tpu as pltpu

IMG, PATCH, IN_C, DIM, HEADS = 28, 7, 3, 128, 4
GRID_HW = IMG // PATCH              # 4
NPATCH = GRID_HW * GRID_HW          # 16 tokens per image
HEAD_DIM = DIM // HEADS             # 32
PDIM = IN_C * PATCH * PATCH         # 147
PDIM_PAD = 256                      # zero-padded contraction dim
NN = NPATCH * NPATCH                # 256
QKV = 2 * DIM + HEADS * DIM         # 768: [Q*scale | K | Wv@Wo per head]
EPS = 1e-5
NEG = -1e9


def _stream_kernel(p_ref, pos_ref, m_in_ref, pick_ref, blk_ref, m_diag_ref,
                   bias_ref, pool_ref, wproj_ref, bproj_ref, wgate_ref,
                   bsp_ref, wqkv_ref, bqk_ref, w3_ref, b4_ref, ln_ref, o_ref):
    f32, bf16 = jnp.float32, jnp.bfloat16
    toks = p_ref.shape[0]

    # ---- patch embedding (stride-7 conv as bf16 matmul) -> (toks, DIM) f32 ----
    emb = (jnp.dot(p_ref[...], wproj_ref[...], preferred_element_type=f32)
           + bproj_ref[...])

    # ---- SpatialAttention gate: sigmoid(7x7 conv) folded to dense matmuls ----
    # v[(b,t''), t*16+t'] = emb[(b,t''),:] . wgate[:, t*16+t']
    v = jnp.dot(emb.astype(bf16), wgate_ref[...], preferred_element_type=f32)
    vm = v.astype(bf16) * m_in_ref[...]                         # keep t' == row token
    lcol = jnp.dot(vm, pick_ref[...], preferred_element_type=f32)          # (toks, 16)
    lfull = jnp.dot(blk_ref[...], lcol.astype(bf16),
                    preferred_element_type=f32)                 # within-image sum
    m_diag = m_diag_ref[...]
    logits = (jnp.sum(lfull * m_diag, axis=-1, keepdims=True)
              + bsp_ref[...])                                   # (toks, 1)
    # pos-embed broadcast via one tiny matmul (no relayout): (toks,16)@(16,DIM)
    pos_t = jnp.dot(m_diag, pos_ref[...], preferred_element_type=f32)
    x = emb * jax.nn.sigmoid(logits) + pos_t                    # (toks, DIM) f32

    # ---- MHA: fused [Q*scale | K | Wv@Wo] projection, block-diag softmax ----
    qkv = jnp.dot(x.astype(bf16), wqkv_ref[...], preferred_element_type=f32)
    qb = (qkv[:, 0:DIM] + bqk_ref[:, 0:DIM]).astype(bf16)
    kb = (qkv[:, DIM:2 * DIM] + bqk_ref[:, DIM:2 * DIM]).astype(bf16)
    bias = bias_ref[...]                                        # 0 / -1e9 block-diag
    attn = jnp.zeros((toks, DIM), f32)
    for h in range(HEADS):
        sl = slice(h * HEAD_DIM, (h + 1) * HEAD_DIM)
        s = lax.dot_general(qb[:, sl], kb[:, sl], (((1,), (1,)), ((), ())),
                            preferred_element_type=f32) + bias
        s = s - jnp.max(s, axis=-1, keepdims=True)
        pr = jnp.exp(s)
        # approx reciprocal: ~1e-3 rel error vs exact divide (fine for inference)
        pr = pr * pl.reciprocal(jnp.sum(pr, axis=-1, keepdims=True), approx=True)
        vsl = slice(2 * DIM + h * DIM, 2 * DIM + (h + 1) * DIM)
        attn = attn + jnp.dot(pr.astype(bf16), qkv[:, vsl].astype(bf16),
                              preferred_element_type=f32)
    x1 = attn + b4_ref[:, 0:DIM] + x          # output bias = bv @ Wo + bo (folded)

    # ---- x = norm1(attn_out + x) ----
    g1, be1 = ln_ref[:, 0:DIM], ln_ref[:, DIM:2 * DIM]
    g2, be2 = ln_ref[:, 2 * DIM:3 * DIM], ln_ref[:, 3 * DIM:4 * DIM]
    mu1 = jnp.mean(x1, axis=-1, keepdims=True)
    xc1 = x1 - mu1
    var1 = jnp.mean(xc1 * xc1, axis=-1, keepdims=True)
    x1 = xc1 * lax.rsqrt(var1 + EPS) * g1 + be1

    # ---- x = norm2(mlp(x) + x) ----
    h1 = jnp.maximum(
        jnp.dot(x1.astype(bf16), w3_ref[:, 0:DIM], preferred_element_type=f32)
        + b4_ref[:, DIM:2 * DIM], 0.0)
    h2 = (jnp.dot(h1.astype(bf16), w3_ref[:, DIM:2 * DIM],
                  preferred_element_type=f32)
          + b4_ref[:, 2 * DIM:3 * DIM])
    x2 = h2 + x1
    mu2 = jnp.mean(x2, axis=-1, keepdims=True)
    xc2 = x2 - mu2
    var2 = jnp.mean(xc2 * xc2, axis=-1, keepdims=True)
    x2 = xc2 * lax.rsqrt(var2 + EPS) * g2 + be2

    # ---- per-image mean pool (matmul with resident pool matrix) + final fc ----
    pooled = jnp.dot(pool_ref[...], x2.astype(bf16), preferred_element_type=f32)
    o_ref[0] = (jnp.dot(pooled.astype(bf16), w3_ref[:, 2 * DIM:3 * DIM],
                        preferred_element_type=f32)
                + b4_ref[:, 3 * DIM:4 * DIM])


def _choose_tb(b):
    # keep M = TB*16 rows per step large, but ensure >= 2 grid steps whenever
    # possible so v7x's second TensorCore gets work on the "parallel" axis.
    if b >= 64:
        return 32
    if b >= 32:
        return 16
    if b >= 16:
        return 8
    return max(1, (b + 1) // 2)


def _masks(tb):
    toks = tb * NPATCH
    tok = jnp.arange(toks) % NPATCH
    col = jnp.arange(NN)
    out_tok = jnp.arange(NPATCH)
    m_in = (col[None, :] % NPATCH == tok[:, None]).astype(jnp.bfloat16)   # (toks, NN)
    pick = (col[:, None] // NPATCH == out_tok[None, :]).astype(jnp.bfloat16)  # (NN, 16)
    img_r = jnp.arange(toks)[:, None] // NPATCH
    img_c = jnp.arange(toks)[None, :] // NPATCH
    same = img_r == img_c
    blk = same.astype(jnp.bfloat16)                                       # (toks, toks)
    bias = jnp.where(same, 0.0, NEG).astype(jnp.float32)                  # (toks, toks)
    m_diag = (tok[:, None] == out_tok[None, :]).astype(jnp.float32)       # (toks, 16)
    pool = (jnp.arange(toks)[None, :] // NPATCH == jnp.arange(tb)[:, None])
    pool = (pool.astype(jnp.float32) / NPATCH).astype(jnp.bfloat16)       # (tb, toks)
    return m_in, pick, blk, bias, m_diag, pool


def appearance_stream(x, params):
    b = x.shape[0]
    tb = _choose_tb(b)
    toks = tb * NPATCH
    bp = ((b + tb - 1) // tb) * tb
    steps = bp // tb

    # host glue: non-overlapping 7x7 patch im2col, features in (c, kh, kw) order
    p = x.reshape(b, IN_C, GRID_HW, PATCH, GRID_HW, PATCH)
    p = jnp.transpose(p, (0, 2, 4, 1, 3, 5)).reshape(b, NPATCH, PDIM)
    p = jnp.pad(p, ((0, bp - b), (0, 0), (0, PDIM_PAD - PDIM)))
    p = p.reshape(bp * NPATCH, PDIM_PAD).astype(jnp.bfloat16)

    m_in, pick, blk, bias, m_diag, pool = _masks(tb)

    operands = (p, params["pos"], m_in, pick, blk, m_diag, bias, pool,
                params["wproj"], params["bproj"], params["wgate"],
                params["bsp"], params["wqkv"], params["bqk"], params["w3"],
                params["b4"], params["ln"])

    def cs(shape):
        return pl.BlockSpec(shape, lambda i: (0,) * len(shape))

    mm = 2 * toks * (PDIM_PAD * DIM + DIM * NN + NN * NPATCH + toks * NPATCH
                     + NPATCH * DIM + DIM * QKV
                     + HEADS * (HEAD_DIM * toks + toks * DIM) + 2 * DIM * DIM)
    mm += 2 * tb * (toks * DIM + DIM * DIM)
    cost = pl.CostEstimate(
        flops=int(steps * mm),
        transcendentals=int(steps * (toks + HEADS * toks * toks)),
        bytes_accessed=int(sum(int(a.size) * a.dtype.itemsize for a in operands)
                           + bp * DIM * 4))

    out = pl.pallas_call(
        _stream_kernel,
        out_shape=jax.ShapeDtypeStruct((steps, tb, DIM), jnp.float32),
        grid=(steps,),
        in_specs=[
            pl.BlockSpec((toks, PDIM_PAD), lambda i: (i, 0)),   # patches
            cs((NPATCH, DIM)),          # pos (native shape)
            cs((toks, NN)),             # m_in
            cs((NN, NPATCH)),           # pick (column-group sum)
            cs((toks, toks)),           # blk_ones (within-image sum)
            cs((toks, NPATCH)),         # m_diag
            cs((toks, toks)),           # attention additive bias
            cs((tb, toks)),             # mean-pool matrix
            cs((PDIM_PAD, DIM)),        # wproj
            cs((1, DIM)),               # bproj
            cs((DIM, NN)),              # wgate (folded 7x7 conv)
            cs((1, 1)),                 # bsp
            cs((DIM, QKV)),             # [Q*scale | K | Wv@Wo]
            cs((1, 2 * DIM)),           # [bq*scale | bk]
            cs((DIM, 3 * DIM)),         # [w1 | w2 | wfc]
            cs((1, 4 * DIM)),           # [battn | b1 | b2 | bfc]
            cs((1, 4 * DIM)),           # [g1 | be1 | g2 | be2]
        ],
        out_specs=pl.BlockSpec((1, tb, DIM), lambda i: (i, 0, 0)),
        compiler_params=pltpu.CompilerParams(
            dimension_semantics=("parallel",)),
        cost_estimate=cost,
    )(*operands)
    return out.reshape(bp, DIM)[:b]


def init_params(key):
    ks = jax.random.split(key, 16)
    n = lambda k, shp, s=0.02: (s * jax.random.normal(k, shp)).astype(jnp.float32)
    scale = 1.0 / (HEAD_DIM ** 0.5)

    # proj: Conv2d(3, 128, k=7, stride=7) -> (PDIM_PAD, DIM) matmul weight
    w_proj = n(ks[0], (DIM, IN_C, PATCH, PATCH))
    wproj = jnp.pad(w_proj.reshape(DIM, PDIM).T, ((0, PDIM_PAD - PDIM), (0, 0)))
    bproj = n(ks[1], (1, DIM))

    # SpatialAttention Conv2d(128, 1, k=7, pad=3) folded to a dense weight:
    # wgate[c, t*16 + t'] = w_sp[0, c, 3 + r_t' - r_t, 3 + c_t' - c_t]
    # (all taps in range because GRID_HW=4 <= kernel radius + 1)
    w_sp = n(ks[2], (1, DIM, PATCH, PATCH))
    rt = jnp.arange(NPATCH) // GRID_HW
    ct = jnp.arange(NPATCH) % GRID_HW
    kh = 3 + rt[None, :] - rt[:, None]          # [t_out, t_in]
    kw = 3 + ct[None, :] - ct[:, None]
    wgate = w_sp[0][:, kh, kw].reshape(DIM, NN)
    bsp = n(ks[3], (1, 1))

    pos = n(ks[4], (NPATCH, DIM), 1.0)          # pos_embed ~ randn

    # MultiheadAttention: fold softmax scale into Q, Wo into V (per head),
    # and the V bias into a constant output bias (softmax rows sum to 1).
    in_w = n(ks[5], (3 * DIM, DIM))
    in_b = n(ks[6], (3 * DIM,))
    wo = n(ks[7], (DIM, DIM))
    bo = n(ks[8], (DIM,))
    wq = in_w[0:DIM].T * scale
    wk = in_w[DIM:2 * DIM].T
    wv = in_w[2 * DIM:3 * DIM].T
    wo_t = wo.T
    wvo = [wv[:, h * HEAD_DIM:(h + 1) * HEAD_DIM]
           @ wo_t[h * HEAD_DIM:(h + 1) * HEAD_DIM, :] for h in range(HEADS)]
    wqkv = jnp.concatenate([wq, wk] + wvo, axis=1)            # (DIM, QKV)
    bqk = jnp.concatenate([in_b[0:DIM] * scale,
                           in_b[DIM:2 * DIM]]).reshape(1, 2 * DIM)
    battn = (in_b[2 * DIM:3 * DIM] @ wo_t + bo).reshape(1, DIM)

    w1 = n(ks[9], (DIM, DIM)).T;   b1 = n(ks[10], (1, DIM))
    w2 = n(ks[11], (DIM, DIM)).T;  b2 = n(ks[12], (1, DIM))
    wfc = n(ks[13], (DIM, DIM)).T; bfc = n(ks[14], (1, DIM))
    w3 = jnp.concatenate([w1, w2, wfc], axis=1)               # (DIM, 3*DIM)
    b4 = jnp.concatenate([battn, b1, b2, bfc], axis=1)        # (1, 4*DIM)
    ln = jnp.concatenate([jnp.ones((1, DIM)), jnp.zeros((1, DIM)),
                          jnp.ones((1, DIM)), jnp.zeros((1, DIM))],
                         axis=1).astype(jnp.float32)          # (1, 4*DIM)

    return dict(wproj=wproj.astype(jnp.bfloat16), bproj=bproj,
                wgate=wgate.astype(jnp.bfloat16), bsp=bsp, pos=pos,
                wqkv=wqkv.astype(jnp.bfloat16), bqk=bqk,
                w3=w3.astype(jnp.bfloat16), b4=b4, ln=ln)


if __name__ == "__main__":
    key = jax.random.PRNGKey(0)
    kx, kp = jax.random.split(key)
    B = 2
    x = jax.random.normal(kx, (B, IN_C, IMG, IMG), dtype=jnp.float32)
    params = init_params(kp)
    out = jax.jit(appearance_stream)(x, params)
    jax.block_until_ready(out)
    assert out.shape == (B, 128) and out.dtype == jnp.float32
    assert bool(jnp.isfinite(out).all())
    print("KERNEL_OK")
</pallas_src>

<mosaic_0001>
module attributes {stable_mosaic.version = 11 : i64} {
  func.func @_stream_kernel(%arg0: i32, %arg1: memref<16x256xbf16, #tpu.memory_space<vmem>>, %arg2: memref<16x128xf32, #tpu.memory_space<vmem>>, %arg3: memref<16x256xbf16, #tpu.memory_space<vmem>>, %arg4: memref<256x16xbf16, #tpu.memory_space<vmem>>, %arg5: memref<16x16xbf16, #tpu.memory_space<vmem>>, %arg6: memref<16x16xf32, #tpu.memory_space<vmem>>, %arg7: memref<16x16xf32, #tpu.memory_space<vmem>>, %arg8: memref<1x16xbf16, #tpu.memory_space<vmem>>, %arg9: memref<256x128xbf16, #tpu.memory_space<vmem>>, %arg10: memref<1x128xf32, #tpu.memory_space<vmem>>, %arg11: memref<128x256xbf16, #tpu.memory_space<vmem>>, %arg12: memref<1x1xf32, #tpu.memory_space<vmem>>, %arg13: memref<128x768xbf16, #tpu.memory_space<vmem>>, %arg14: memref<1x256xf32, #tpu.memory_space<vmem>>, %arg15: memref<128x384xbf16, #tpu.memory_space<vmem>>, %arg16: memref<1x512xf32, #tpu.memory_space<vmem>>, %arg17: memref<1x512xf32, #tpu.memory_space<vmem>>, %arg18: memref<1x1x128xf32, #tpu.memory_space<vmem>>) attributes {dimension_semantics = [#tpu.dimension_semantics<parallel>], iteration_bounds = array<i64: 2>, scalar_prefetch = 0 : i64, scratch_operands = 0 : i64, tpu.core_type = #tpu.core_type<tc>, window_params = [{transform_indices = @transform_0, window_bounds = array<i64: 16, 256>}, {pipeline_mode = #tpu.pipeline_mode<synchronous>, transform_indices = @transform_1, window_bounds = array<i64: 16, 128>}, {pipeline_mode = #tpu.pipeline_mode<synchronous>, transform_indices = @transform_2, window_bounds = array<i64: 16, 256>}, {pipeline_mode = #tpu.pipeline_mode<synchronous>, transform_indices = @transform_3, window_bounds = array<i64: 256, 16>}, {pipeline_mode = #tpu.pipeline_mode<synchronous>, transform_indices = @transform_4, window_bounds = array<i64: 16, 16>}, {pipeline_mode = #tpu.pipeline_mode<synchronous>, transform_indices = @transform_5, window_bounds = array<i64: 16, 16>}, {pipeline_mode = #tpu.pipeline_mode<synchronous>, transform_indices = @transform_6, window_bounds = array<i64: 16, 16>}, {pipeline_mode = #tpu.pipeline_mode<synchronous>, transform_indices = @transform_7, window_bounds = array<i64: 1, 16>}, {pipeline_mode = #tpu.pipeline_mode<synchronous>, transform_indices = @transform_8, window_bounds = array<i64: 256, 128>}, {pipeline_mode = #tpu.pipeline_mode<synchronous>, transform_indices = @transform_9, window_bounds = array<i64: 1, 128>}, {pipeline_mode = #tpu.pipeline_mode<synchronous>, transform_indices = @transform_10, window_bounds = array<i64: 128, 256>}, {pipeline_mode = #tpu.pipeline_mode<synchronous>, transform_indices = @transform_11, window_bounds = array<i64: 1, 1>}, {pipeline_mode = #tpu.pipeline_mode<synchronous>, transform_indices = @transform_12, window_bounds = array<i64: 128, 768>}, {pipeline_mode = #tpu.pipeline_mode<synchronous>, transform_indices = @transform_13, window_bounds = array<i64: 1, 256>}, {pipeline_mode = #tpu.pipeline_mode<synchronous>, transform_indices = @transform_14, window_bounds = array<i64: 128, 384>}, {pipeline_mode = #tpu.pipeline_mode<synchronous>, transform_indices = @transform_15, window_bounds = array<i64: 1, 512>}, {pipeline_mode = #tpu.pipeline_mode<synchronous>, transform_indices = @transform_16, window_bounds = array<i64: 1, 512>}, {transform_indices = @transform_17, window_bounds = array<i64: 1, 1, 128>}]} {
    %c0 = arith.constant 0 : index
    %c0_0 = arith.constant 0 : index
    %0 = vector.load %arg1[%c0, %c0_0] : memref<16x256xbf16, #tpu.memory_space<vmem>>, vector<16x256xbf16>
    %c0_1 = arith.constant 0 : index
    %c0_2 = arith.constant 0 : index
    %1 = vector.load %arg9[%c0_1, %c0_2] : memref<256x128xbf16, #tpu.memory_space<vmem>>, vector<256x128xbf16>
    %cst = arith.constant dense<0.000000e+00> : vector<16x128xf32>
    %2 = tpu.matmul %0, %1, %cst {dimension_numbers = #tpu.dot_dimension_numbers<[1], [0], [0], [1], [0, 0, 1, 1], [], []>} : vector<16x256xbf16>, vector<256x128xbf16>, vector<16x128xf32> -> vector<16x128xf32>
    %c0_3 = arith.constant 0 : index
    %c0_4 = arith.constant 0 : index
    %3 = vector.load %arg10[%c0_3, %c0_4] : memref<1x128xf32, #tpu.memory_space<vmem>>, vector<1x128xf32>
    %4 = vector.broadcast %3 : vector<1x128xf32> to vector<16x128xf32>
    %5 = arith.addf %2, %4 : vector<16x128xf32>
    %6 = arith.truncf %5 : vector<16x128xf32> to vector<16x128xbf16>
    %c0_5 = arith.constant 0 : index
    %c0_6 = arith.constant 0 : index
    %7 = vector.load %arg11[%c0_5, %c0_6] : memref<128x256xbf16, #tpu.memory_space<vmem>>, vector<128x256xbf16>
    %cst_7 = arith.constant dense<0.000000e+00> : vector<16x256xf32>
    %8 = tpu.matmul %6, %7, %cst_7 {dimension_numbers = #tpu.dot_dimension_numbers<[1], [0], [0], [1], [0, 0, 1, 1], [], []>} : vector<16x128xbf16>, vector<128x256xbf16>, vector<16x256xf32> -> vector<16x256xf32>
    %9 = arith.truncf %8 : vector<16x256xf32> to vector<16x256xbf16>
    %c0_8 = arith.constant 0 : index
    %c0_9 = arith.constant 0 : index
    %10 = vector.load %arg3[%c0_8, %c0_9] : memref<16x256xbf16, #tpu.memory_space<vmem>>, vector<16x256xbf16>
    %11 = arith.mulf %9, %10 : vector<16x256xbf16>
    %c0_10 = arith.constant 0 : index
    %c0_11 = arith.constant 0 : index
    %12 = vector.load %arg4[%c0_10, %c0_11] : memref<256x16xbf16, #tpu.memory_space<vmem>>, vector<256x16xbf16>
    %cst_12 = arith.constant dense<0.000000e+00> : vector<16x16xf32>
    %13 = tpu.matmul %11, %12, %cst_12 {dimension_numbers = #tpu.dot_dimension_numbers<[1], [0], [0], [1], [0, 0, 1, 1], [], []>} : vector<16x256xbf16>, vector<256x16xbf16>, vector<16x16xf32> -> vector<16x16xf32>
    %c0_13 = arith.constant 0 : index
    %c0_14 = arith.constant 0 : index
    %14 = vector.load %arg5[%c0_13, %c0_14] : memref<16x16xbf16, #tpu.memory_space<vmem>>, vector<16x16xbf16>
    %15 = arith.truncf %13 : vector<16x16xf32> to vector<16x16xbf16>
    %cst_15 = arith.constant dense<0.000000e+00> : vector<16x16xf32>
    %16 = tpu.matmul %14, %15, %cst_15 {dimension_numbers = #tpu.dot_dimension_numbers<[1], [0], [0], [1], [0, 0, 1, 1], [], []>} : vector<16x16xbf16>, vector<16x16xbf16>, vector<16x16xf32> -> vector<16x16xf32>
    %c0_16 = arith.constant 0 : index
    %c0_17 = arith.constant 0 : index
    %17 = vector.load %arg6[%c0_16, %c0_17] : memref<16x16xf32, #tpu.memory_space<vmem>>, vector<16x16xf32>
    %18 = arith.mulf %16, %17 : vector<16x16xf32>
    %cst_18 = arith.constant dense<0.000000e+00> : vector<16xf32>
    %19 = vector.multi_reduction <add>, %18, %cst_18 [1] : vector<16x16xf32> to vector<16xf32>
    %20 = vector.shape_cast %19 : vector<16xf32> to vector<16x1xf32>
    %c0_19 = arith.constant 0 : index
    %c0_20 = arith.constant 0 : index
    %21 = vector.load %arg12[%c0_19, %c0_20] : memref<1x1xf32, #tpu.memory_space<vmem>>, vector<1x1xf32>
    %22 = vector.broadcast %21 : vector<1x1xf32> to vector<16x1xf32>
    %23 = arith.addf %20, %22 : vector<16x1xf32>
    %c0_21 = arith.constant 0 : index
    %c0_22 = arith.constant 0 : index
    %24 = vector.load %arg2[%c0_21, %c0_22] : memref<16x128xf32, #tpu.memory_space<vmem>>, vector<16x128xf32>
    %cst_23 = arith.constant dense<0.000000e+00> : vector<16x128xf32>
    %25 = tpu.matmul %17, %24, %cst_23 {dimension_numbers = #tpu.dot_dimension_numbers<[1], [0], [0], [1], [0, 0, 1, 1], [], []>} : vector<16x16xf32>, vector<16x128xf32>, vector<16x128xf32> -> vector<16x128xf32>
    %26 = arith.negf %23 : vector<16x1xf32>
    %27 = math.exp %26 : vector<16x1xf32>
    %cst_24 = arith.constant 1.000000e+00 : f32
    %28 = vector.broadcast %cst_24 : f32 to vector<16x1xf32>
    %29 = arith.addf %28, %27 : vector<16x1xf32>
    %30 = arith.divf %28, %29 : vector<16x1xf32>
    %31 = vector.broadcast %30 : vector<16x1xf32> to vector<16x128xf32>
    %32 = arith.mulf %5, %31 : vector<16x128xf32>
    %33 = arith.addf %32, %25 : vector<16x128xf32>
    %34 = arith.truncf %33 : vector<16x128xf32> to vector<16x128xbf16>
    %c0_25 = arith.constant 0 : index
    %c0_26 = arith.constant 0 : index
    %35 = vector.load %arg13[%c0_25, %c0_26] : memref<128x768xbf16, #tpu.memory_space<vmem>>, vector<128x768xbf16>
    %cst_27 = arith.constant dense<0.000000e+00> : vector<16x768xf32>
    %36 = tpu.matmul %34, %35, %cst_27 {dimension_numbers = #tpu.dot_dimension_numbers<[1], [0], [0], [1], [0, 0, 1, 1], [], []>} : vector<16x128xbf16>, vector<128x768xbf16>, vector<16x768xf32> -> vector<16x768xf32>
    %37 = vector.extract_strided_slice %36 {offsets = [0, 0], sizes = [16, 128], strides = [1, 1]} : vector<16x768xf32> to vector<16x128xf32>
    %c0_28 = arith.constant 0 : index
    %c0_29 = arith.constant 0 : index
    %38 = vector.load %arg14[%c0_28, %c0_29] : memref<1x256xf32, #tpu.memory_space<vmem>>, vector<1x128xf32>
    %39 = vector.broadcast %38 : vector<1x128xf32> to vector<16x128xf32>
    %40 = arith.addf %37, %39 : vector<16x128xf32>
    %41 = arith.truncf %40 : vector<16x128xf32> to vector<16x128xbf16>
    %42 = vector.extract_strided_slice %36 {offsets = [0, 128], sizes = [16, 128], strides = [1, 1]} : vector<16x768xf32> to vector<16x128xf32>
    %c0_30 = arith.constant 0 : index
    %c128 = arith.constant 128 : index
    %43 = vector.load %arg14[%c0_30, %c128] : memref<1x256xf32, #tpu.memory_space<vmem>>, vector<1x128xf32>
    %44 = vector.broadcast %43 : vector<1x128xf32> to vector<16x128xf32>
    %45 = arith.addf %42, %44 : vector<16x128xf32>
    %46 = arith.truncf %45 : vector<16x128xf32> to vector<16x128xbf16>
    %c0_31 = arith.constant 0 : index
    %c0_32 = arith.constant 0 : index
    %47 = vector.load %arg7[%c0_31, %c0_32] : memref<16x16xf32, #tpu.memory_space<vmem>>, vector<16x16xf32>
    %cst_33 = arith.constant 0.000000e+00 : f32
    %48 = vector.broadcast %cst_33 : f32 to vector<16x128xf32>
    %49 = vector.extract_strided_slice %41 {offsets = [0, 0], sizes = [16, 32], strides = [1, 1]} : vector<16x128xbf16> to vector<16x32xbf16>
    %50 = vector.extract_strided_slice %46 {offsets = [0, 0], sizes = [16, 32], strides = [1, 1]} : vector<16x128xbf16> to vector<16x32xbf16>
    %cst_34 = arith.constant dense<0.000000e+00> : vector<16x16xf32>
    %51 = tpu.matmul %49, %50, %cst_34 {dimension_numbers = #tpu.dot_dimension_numbers<[1], [1], [0], [0], [0, 0, 1, 0], [], []>} : vector<16x32xbf16>, vector<16x32xbf16>, vector<16x16xf32> -> vector<16x16xf32>
    %52 = arith.addf %51, %47 : vector<16x16xf32>
    %cst_35 = arith.constant dense<0xFF800000> : vector<16xf32>
    %53 = vector.multi_reduction <maximumf>, %52, %cst_35 [1] : vector<16x16xf32> to vector<16xf32>
    %54 = vector.shape_cast %53 : vector<16xf32> to vector<16x1xf32>
    %55 = vector.broadcast %54 : vector<16x1xf32> to vector<16x16xf32>
    %56 = arith.subf %52, %55 : vector<16x16xf32>
    %57 = math.exp %56 : vector<16x16xf32>
    %cst_36 = arith.constant dense<0.000000e+00> : vector<16xf32>
    %58 = vector.multi_reduction <add>, %57, %cst_36 [1] : vector<16x16xf32> to vector<16xf32>
    %59 = vector.shape_cast %58 : vector<16xf32> to vector<16x1xf32>
    %60 = tpu.reciprocal %59 {approx = true} : vector<16x1xf32> -> vector<16x1xf32>
    %61 = vector.broadcast %60 : vector<16x1xf32> to vector<16x16xf32>
    %62 = arith.mulf %57, %61 : vector<16x16xf32>
    %63 = arith.truncf %62 : vector<16x16xf32> to vector<16x16xbf16>
    %64 = vector.extract_strided_slice %36 {offsets = [0, 256], sizes = [16, 128], strides = [1, 1]} : vector<16x768xf32> to vector<16x128xf32>
    %65 = arith.truncf %64 : vector<16x128xf32> to vector<16x128xbf16>
    %cst_37 = arith.constant dense<0.000000e+00> : vector<16x128xf32>
    %66 = tpu.matmul %63, %65, %cst_37 {dimension_numbers = #tpu.dot_dimension_numbers<[1], [0], [0], [1], [0, 0, 1, 1], [], []>} : vector<16x16xbf16>, vector<16x128xbf16>, vector<16x128xf32> -> vector<16x128xf32>
    %67 = arith.addf %48, %66 : vector<16x128xf32>
    %68 = vector.extract_strided_slice %41 {offsets = [0, 32], sizes = [16, 32], strides = [1, 1]} : vector<16x128xbf16> to vector<16x32xbf16>
    %69 = vector.extract_strided_slice %46 {offsets = [0, 32], sizes = [16, 32], strides = [1, 1]} : vector<16x128xbf16> to vector<16x32xbf16>
    %cst_38 = arith.constant dense<0.000000e+00> : vector<16x16xf32>
    %70 = tpu.matmul %68, %69, %cst_38 {dimension_numbers = #tpu.dot_dimension_numbers<[1], [1], [0], [0], [0, 0, 1, 0], [], []>} : vector<16x32xbf16>, vector<16x32xbf16>, vector<16x16xf32> -> vector<16x16xf32>
    %71 = arith.addf %70, %47 : vector<16x16xf32>
    %cst_39 = arith.constant dense<0xFF800000> : vector<16xf32>
    %72 = vector.multi_reduction <maximumf>, %71, %cst_39 [1] : vector<16x16xf32> to vector<16xf32>
    %73 = vector.shape_cast %72 : vector<16xf32> to vector<16x1xf32>
    %74 = vector.broadcast %73 : vector<16x1xf32> to vector<16x16xf32>
    %75 = arith.subf %71, %74 : vector<16x16xf32>
    %76 = math.exp %75 : vector<16x16xf32>
    %cst_40 = arith.constant dense<0.000000e+00> : vector<16xf32>
    %77 = vector.multi_reduction <add>, %76, %cst_40 [1] : vector<16x16xf32> to vector<16xf32>
    %78 = vector.shape_cast %77 : vector<16xf32> to vector<16x1xf32>
    %79 = tpu.reciprocal %78 {approx = true} : vector<16x1xf32> -> vector<16x1xf32>
    %80 = vector.broadcast %79 : vector<16x1xf32> to vector<16x16xf32>
    %81 = arith.mulf %76, %80 : vector<16x16xf32>
    %82 = arith.truncf %81 : vector<16x16xf32> to vector<16x16xbf16>
    %83 = vector.extract_strided_slice %36 {offsets = [0, 384], sizes = [16, 128], strides = [1, 1]} : vector<16x768xf32> to vector<16x128xf32>
    %84 = arith.truncf %83 : vector<16x128xf32> to vector<16x128xbf16>
    %cst_41 = arith.constant dense<0.000000e+00> : vector<16x128xf32>
    %85 = tpu.matmul %82, %84, %cst_41 {dimension_numbers = #tpu.dot_dimension_numbers<[1], [0], [0], [1], [0, 0, 1, 1], [], []>} : vector<16x16xbf16>, vector<16x128xbf16>, vector<16x128xf32> -> vector<16x128xf32>
    %86 = arith.addf %67, %85 : vector<16x128xf32>
    %87 = vector.extract_strided_slice %41 {offsets = [0, 64], sizes = [16, 32], strides = [1, 1]} : vector<16x128xbf16> to vector<16x32xbf16>
    %88 = vector.extract_strided_slice %46 {offsets = [0, 64], sizes = [16, 32], strides = [1, 1]} : vector<16x128xbf16> to vector<16x32xbf16>
    %cst_42 = arith.constant dense<0.000000e+00> : vector<16x16xf32>
    %89 = tpu.matmul %87, %88, %cst_42 {dimension_numbers = #tpu.dot_dimension_numbers<[1], [1], [0], [0], [0, 0, 1, 0], [], []>} : vector<16x32xbf16>, vector<16x32xbf16>, vector<16x16xf32> -> vector<16x16xf32>
    %90 = arith.addf %89, %47 : vector<16x16xf32>
    %cst_43 = arith.constant dense<0xFF800000> : vector<16xf32>
    %91 = vector.multi_reduction <maximumf>, %90, %cst_43 [1] : vector<16x16xf32> to vector<16xf32>
    %92 = vector.shape_cast %91 : vector<16xf32> to vector<16x1xf32>
    %93 = vector.broadcast %92 : vector<16x1xf32> to vector<16x16xf32>
    %94 = arith.subf %90, %93 : vector<16x16xf32>
    %95 = math.exp %94 : vector<16x16xf32>
    %cst_44 = arith.constant dense<0.000000e+00> : vector<16xf32>
    %96 = vector.multi_reduction <add>, %95, %cst_44 [1] : vector<16x16xf32> to vector<16xf32>
    %97 = vector.shape_cast %96 : vector<16xf32> to vector<16x1xf32>
    %98 = tpu.reciprocal %97 {approx = true} : vector<16x1xf32> -> vector<16x1xf32>
    %99 = vector.broadcast %98 : vector<16x1xf32> to vector<16x16xf32>
    %100 = arith.mulf %95, %99 : vector<16x16xf32>
    %101 = arith.truncf %100 : vector<16x16xf32> to vector<16x16xbf16>
    %102 = vector.extract_strided_slice %36 {offsets = [0, 512], sizes = [16, 128], strides = [1, 1]} : vector<16x768xf32> to vector<16x128xf32>
    %103 = arith.truncf %102 : vector<16x128xf32> to vector<16x128xbf16>
    %cst_45 = arith.constant dense<0.000000e+00> : vector<16x128xf32>
    %104 = tpu.matmul %101, %103, %cst_45 {dimension_numbers = #tpu.dot_dimension_numbers<[1], [0], [0], [1], [0, 0, 1, 1], [], []>} : vector<16x16xbf16>, vector<16x128xbf16>, vector<16x128xf32> -> vector<16x128xf32>
    %105 = arith.addf %86, %104 : vector<16x128xf32>
    %106 = vector.extract_strided_slice %41 {offsets = [0, 96], sizes = [16, 32], strides = [1, 1]} : vector<16x128xbf16> to vector<16x32xbf16>
    %107 = vector.extract_strided_slice %46 {offsets = [0, 96], sizes = [16, 32], strides = [1, 1]} : vector<16x128xbf16> to vector<16x32xbf16>
    %cst_46 = arith.constant dense<0.000000e+00> : vector<16x16xf32>
    %108 = tpu.matmul %106, %107, %cst_46 {dimension_numbers = #tpu.dot_dimension_numbers<[1], [1], [0], [0], [0, 0, 1, 0], [], []>} : vector<16x32xbf16>, vector<16x32xbf16>, vector<16x16xf32> -> vector<16x16xf32>
    %109 = arith.addf %108, %47 : vector<16x16xf32>
    %cst_47 = arith.constant dense<0xFF800000> : vector<16xf32>
    %110 = vector.multi_reduction <maximumf>, %109, %cst_47 [1] : vector<16x16xf32> to vector<16xf32>
    %111 = vector.shape_cast %110 : vector<16xf32> to vector<16x1xf32>
    %112 = vector.broadcast %111 : vector<16x1xf32> to vector<16x16xf32>
    %113 = arith.subf %109, %112 : vector<16x16xf32>
    %114 = math.exp %113 : vector<16x16xf32>
    %cst_48 = arith.constant dense<0.000000e+00> : vector<16xf32>
    %115 = vector.multi_reduction <add>, %114, %cst_48 [1] : vector<16x16xf32> to vector<16xf32>
    %116 = vector.shape_cast %115 : vector<16xf32> to vector<16x1xf32>
    %117 = tpu.reciprocal %116 {approx = true} : vector<16x1xf32> -> vector<16x1xf32>
    %118 = vector.broadcast %117 : vector<16x1xf32> to vector<16x16xf32>
    %119 = arith.mulf %114, %118 : vector<16x16xf32>
    %120 = arith.truncf %119 : vector<16x16xf32> to vector<16x16xbf16>
    %121 = vector.extract_strided_slice %36 {offsets = [0, 640], sizes = [16, 128], strides = [1, 1]} : vector<16x768xf32> to vector<16x128xf32>
    %122 = arith.truncf %121 : vector<16x128xf32> to vector<16x128xbf16>
    %cst_49 = arith.constant dense<0.000000e+00> : vector<16x128xf32>
    %123 = tpu.matmul %120, %122, %cst_49 {dimension_numbers = #tpu.dot_dimension_numbers<[1], [0], [0], [1], [0, 0, 1, 1], [], []>} : vector<16x16xbf16>, vector<16x128xbf16>, vector<16x128xf32> -> vector<16x128xf32>
    %124 = arith.addf %105, %123 : vector<16x128xf32>
    %c0_50 = arith.constant 0 : index
    %c0_51 = arith.constant 0 : index
    %125 = vector.load %arg16[%c0_50, %c0_51] : memref<1x512xf32, #tpu.memory_space<vmem>>, vector<1x128xf32>
    %126 = vector.broadcast %125 : vector<1x128xf32> to vector<16x128xf32>
    %127 = arith.addf %124, %126 : vector<16x128xf32>
    %128 = arith.addf %127, %33 : vector<16x128xf32>
    %c0_52 = arith.constant 0 : index
    %c0_53 = arith.constant 0 : index
    %129 = vector.load %arg17[%c0_52, %c0_53] : memref<1x512xf32, #tpu.memory_space<vmem>>, vector<1x128xf32>
    %c0_54 = arith.constant 0 : index
    %c128_55 = arith.constant 128 : index
    %130 = vector.load %arg17[%c0_54, %c128_55] : memref<1x512xf32, #tpu.memory_space<vmem>>, vector<1x128xf32>
    %c0_56 = arith.constant 0 : index
    %c256 = arith.constant 256 : index
    %131 = vector.load %arg17[%c0_56, %c256] : memref<1x512xf32, #tpu.memory_space<vmem>>, vector<1x128xf32>
    %c0_57 = arith.constant 0 : index
    %c384 = arith.constant 384 : index
    %132 = vector.load %arg17[%c0_57, %c384] : memref<1x512xf32, #tpu.memory_space<vmem>>, vector<1x128xf32>
    %cst_58 = arith.constant dense<0.000000e+00> : vector<16xf32>
    %133 = vector.multi_reduction <add>, %128, %cst_58 [1] : vector<16x128xf32> to vector<16xf32>
    %134 = vector.shape_cast %133 : vector<16xf32> to vector<16x1xf32>
    %cst_59 = arith.constant 1.280000e+02 : f32
    %135 = vector.broadcast %cst_59 : f32 to vector<16x1xf32>
    %136 = arith.divf %134, %135 : vector<16x1xf32>
    %137 = vector.broadcast %136 : vector<16x1xf32> to vector<16x128xf32>
    %138 = arith.subf %128, %137 : vector<16x128xf32>
    %139 = arith.mulf %138, %138 : vector<16x128xf32>
    %cst_60 = arith.constant dense<0.000000e+00> : vector<16xf32>
    %140 = vector.multi_reduction <add>, %139, %cst_60 [1] : vector<16x128xf32> to vector<16xf32>
    %141 = vector.shape_cast %140 : vector<16xf32> to vector<16x1xf32>
    %cst_61 = arith.constant 1.280000e+02 : f32
    %142 = vector.broadcast %cst_61 : f32 to vector<16x1xf32>
    %143 = arith.divf %141, %142 : vector<16x1xf32>
    %cst_62 = arith.constant 9.99999974E-6 : f32
    %144 = vector.broadcast %cst_62 : f32 to vector<16x1xf32>
    %145 = arith.addf %143, %144 : vector<16x1xf32>
    %146 = math.rsqrt %145 : vector<16x1xf32>
    %147 = vector.broadcast %146 : vector<16x1xf32> to vector<16x128xf32>
    %148 = arith.mulf %138, %147 : vector<16x128xf32>
    %149 = vector.broadcast %129 : vector<1x128xf32> to vector<16x128xf32>
    %150 = arith.mulf %148, %149 : vector<16x128xf32>
    %151 = vector.broadcast %130 : vector<1x128xf32> to vector<16x128xf32>
    %152 = arith.addf %150, %151 : vector<16x128xf32>
    %153 = arith.truncf %152 : vector<16x128xf32> to vector<16x128xbf16>
    %c0_63 = arith.constant 0 : index
    %c0_64 = arith.constant 0 : index
    %154 = vector.load %arg15[%c0_63, %c0_64] : memref<128x384xbf16, #tpu.memory_space<vmem>>, vector<128x128xbf16>
    %cst_65 = arith.constant dense<0.000000e+00> : vector<16x128xf32>
    %155 = tpu.matmul %153, %154, %cst_65 {dimension_numbers = #tpu.dot_dimension_numbers<[1], [0], [0], [1], [0, 0, 1, 1], [], []>} : vector<16x128xbf16>, vector<128x128xbf16>, vector<16x128xf32> -> vector<16x128xf32>
    %c0_66 = arith.constant 0 : index
    %c128_67 = arith.constant 128 : index
    %156 = vector.load %arg16[%c0_66, %c128_67] : memref<1x512xf32, #tpu.memory_space<vmem>>, vector<1x128xf32>
    %157 = vector.broadcast %156 : vector<1x128xf32> to vector<16x128xf32>
    %158 = arith.addf %155, %157 : vector<16x128xf32>
    %cst_68 = arith.constant 0.000000e+00 : f32
    %159 = vector.broadcast %cst_68 : f32 to vector<16x128xf32>
    %160 = arith.maximumf %158, %159 : vector<16x128xf32>
    %161 = arith.truncf %160 : vector<16x128xf32> to vector<16x128xbf16>
    %c0_69 = arith.constant 0 : index
    %c128_70 = arith.constant 128 : index
    %162 = vector.load %arg15[%c0_69, %c128_70] : memref<128x384xbf16, #tpu.memory_space<vmem>>, vector<128x128xbf16>
    %cst_71 = arith.constant dense<0.000000e+00> : vector<16x128xf32>
    %163 = tpu.matmul %161, %162, %cst_71 {dimension_numbers = #tpu.dot_dimension_numbers<[1], [0], [0], [1], [0, 0, 1, 1], [], []>} : vector<16x128xbf16>, vector<128x128xbf16>, vector<16x128xf32> -> vector<16x128xf32>
    %c0_72 = arith.constant 0 : index
    %c256_73 = arith.constant 256 : index
    %164 = vector.load %arg16[%c0_72, %c256_73] : memref<1x512xf32, #tpu.memory_space<vmem>>, vector<1x128xf32>
    %165 = vector.broadcast %164 : vector<1x128xf32> to vector<16x128xf32>
    %166 = arith.addf %163, %165 : vector<16x128xf32>
    %167 = arith.addf %166, %152 : vector<16x128xf32>
    %cst_74 = arith.constant dense<0.000000e+00> : vector<16xf32>
    %168 = vector.multi_reduction <add>, %167, %cst_74 [1] : vector<16x128xf32> to vector<16xf32>
    %169 = vector.shape_cast %168 : vector<16xf32> to vector<16x1xf32>
    %cst_75 = arith.constant 1.280000e+02 : f32
    %170 = vector.broadcast %cst_75 : f32 to vector<16x1xf32>
    %171 = arith.divf %169, %170 : vector<16x1xf32>
    %172 = vector.broadcast %171 : vector<16x1xf32> to vector<16x128xf32>
    %173 = arith.subf %167, %172 : vector<16x128xf32>
    %174 = arith.mulf %173, %173 : vector<16x128xf32>
    %cst_76 = arith.constant dense<0.000000e+00> : vector<16xf32>
    %175 = vector.multi_reduction <add>, %174, %cst_76 [1] : vector<16x128xf32> to vector<16xf32>
    %176 = vector.shape_cast %175 : vector<16xf32> to vector<16x1xf32>
    %cst_77 = arith.constant 1.280000e+02 : f32
    %177 = vector.broadcast %cst_77 : f32 to vector<16x1xf32>
    %178 = arith.divf %176, %177 : vector<16x1xf32>
    %cst_78 = arith.constant 9.99999974E-6 : f32
    %179 = vector.broadcast %cst_78 : f32 to vector<16x1xf32>
    %180 = arith.addf %178, %179 : vector<16x1xf32>
    %181 = math.rsqrt %180 : vector<16x1xf32>
    %182 = vector.broadcast %181 : vector<16x1xf32> to vector<16x128xf32>
    %183 = arith.mulf %173, %182 : vector<16x128xf32>
    %184 = vector.broadcast %131 : vector<1x128xf32> to vector<16x128xf32>
    %185 = arith.mulf %183, %184 : vector<16x128xf32>
    %186 = vector.broadcast %132 : vector<1x128xf32> to vector<16x128xf32>
    %187 = arith.addf %185, %186 : vector<16x128xf32>
    %c0_79 = arith.constant 0 : index
    %c0_80 = arith.constant 0 : index
    %188 = vector.load %arg8[%c0_79, %c0_80] : memref<1x16xbf16, #tpu.memory_space<vmem>>, vector<1x16xbf16>
    %189 = arith.truncf %187 : vector<16x128xf32> to vector<16x128xbf16>
    %cst_81 = arith.constant dense<0.000000e+00> : vector<1x128xf32>
    %190 = tpu.matmul %188, %189, %cst_81 {dimension_numbers = #tpu.dot_dimension_numbers<[1], [0], [0], [1], [0, 0, 1, 1], [], []>} : vector<1x16xbf16>, vector<16x128xbf16>, vector<1x128xf32> -> vector<1x128xf32>
    %191 = arith.truncf %190 : vector<1x128xf32> to vector<1x128xbf16>
    %c0_82 = arith.constant 0 : index
    %c256_83 = arith.constant 256 : index
    %192 = vector.load %arg15[%c0_82, %c256_83] : memref<128x384xbf16, #tpu.memory_space<vmem>>, vector<128x128xbf16>
    %cst_84 = arith.constant dense<0.000000e+00> : vector<1x128xf32>
    %193 = tpu.matmul %191, %192, %cst_84 {dimension_numbers = #tpu.dot_dimension_numbers<[1], [0], [0], [1], [0, 0, 1, 1], [], []>} : vector<1x128xbf16>, vector<128x128xbf16>, vector<1x128xf32> -> vector<1x128xf32>
    %c0_85 = arith.constant 0 : index
    %c384_86 = arith.constant 384 : index
    %194 = vector.load %arg16[%c0_85, %c384_86] : memref<1x512xf32, #tpu.memory_space<vmem>>, vector<1x128xf32>
    %195 = arith.addf %193, %194 : vector<1x128xf32>
    %c0_87 = arith.constant 0 : index
    %c0_88 = arith.constant 0 : index
    %c0_89 = arith.constant 0 : index
    %196 = vector.load %arg18[%c0_87, %c0_88, %c0_89] : memref<1x1x128xf32, #tpu.memory_space<vmem>>, vector<1x1x128xf32>
    %197 = vector.shape_cast %196 : vector<1x1x128xf32> to vector<1x128xf32>
    %198 = vector.shape_cast %195 : vector<1x128xf32> to vector<1x1x128xf32>
    tpu.vector_store %arg18[%c0_87, %c0_88, %c0_89], %198 {strides = array<i32>} : memref<1x1x128xf32, #tpu.memory_space<vmem>>, vector<1x1x128xf32>,
    return
  }
  func.func @transform_0(%arg0: i32) -> (i32, i32) {
    %c0_i32 = arith.constant 0 : i32
    %c0_i32_0 = arith.constant 0 : i32
    return %arg0, %c0_i32 : i32, i32
  }
  func.func @transform_1(%arg0: i32) -> (i32, i32) {
    %c0_i32 = arith.constant 0 : i32
    %c0_i32_0 = arith.constant 0 : i32
    %c0_i32_1 = arith.constant 0 : i32
    return %c0_i32, %c0_i32_0 : i32, i32
  }
  func.func @transform_2(%arg0: i32) -> (i32, i32) {
    %c0_i32 = arith.constant 0 : i32
    %c0_i32_0 = arith.constant 0 : i32
    %c0_i32_1 = arith.constant 0 : i32
    return %c0_i32, %c0_i32_0 : i32, i32
  }
  func.func @transform_3(%arg0: i32) -> (i32, i32) {
    %c0_i32 = arith.constant 0 : i32
    %c0_i32_0 = arith.constant 0 : i32
    %c0_i32_1 = arith.constant 0 : i32
    return %c0_i32, %c0_i32_0 : i32, i32
  }
  func.func @transform_4(%arg0: i32) -> (i32, i32) {
    %c0_i32 = arith.constant 0 : i32
    %c0_i32_0 = arith.constant 0 : i32
    %c0_i32_1 = arith.constant 0 : i32
    return %c0_i32, %c0_i32_0 : i32, i32
  }
  func.func @transform_5(%arg0: i32) -> (i32, i32) {
    %c0_i32 = arith.constant 0 : i32
    %c0_i32_0 = arith.constant 0 : i32
    %c0_i32_1 = arith.constant 0 : i32
    return %c0_i32, %c0_i32_0 : i32, i32
  }
  func.func @transform_6(%arg0: i32) -> (i32, i32) {
    %c0_i32 = arith.constant 0 : i32
    %c0_i32_0 = arith.constant 0 : i32
    %c0_i32_1 = arith.constant 0 : i32
    return %c0_i32, %c0_i32_0 : i32, i32
  }
  func.func @transform_7(%arg0: i32) -> (i32, i32) {
    %c0_i32 = arith.constant 0 : i32
    %c0_i32_0 = arith.constant 0 : i32
    %c0_i32_1 = arith.constant 0 : i32
    return %c0_i32, %c0_i32_0 : i32, i32
  }
  func.func @transform_8(%arg0: i32) -> (i32, i32) {
    %c0_i32 = arith.constant 0 : i32
    %c0_i32_0 = arith.constant 0 : i32
    %c0_i32_1 = arith.constant 0 : i32
    return %c0_i32, %c0_i32_0 : i32, i32
  }
  func.func @transform_9(%arg0: i32) -> (i32, i32) {
    %c0_i32 = arith.constant 0 : i32
    %c0_i32_0 = arith.constant 0 : i32
    %c0_i32_1 = arith.constant 0 : i32
    return %c0_i32, %c0_i32_0 : i32, i32
  }
  func.func @transform_10(%arg0: i32) -> (i32, i32) {
    %c0_i32 = arith.constant 0 : i32
    %c0_i32_0 = arith.constant 0 : i32
    %c0_i32_1 = arith.constant 0 : i32
    return %c0_i32, %c0_i32_0 : i32, i32
  }
  func.func @transform_11(%arg0: i32) -> (i32, i32) {
    %c0_i32 = arith.constant 0 : i32
    %c0_i32_0 = arith.constant 0 : i32
    %c0_i32_1 = arith.constant 0 : i32
    return %c0_i32, %c0_i32_0 : i32, i32
  }
  func.func @transform_12(%arg0: i32) -> (i32, i32) {
    %c0_i32 = arith.constant 0 : i32
    %c0_i32_0 = arith.constant 0 : i32
    %c0_i32_1 = arith.constant 0 : i32
    return %c0_i32, %c0_i32_0 : i32, i32
  }
  func.func @transform_13(%arg0: i32) -> (i32, i32) {
    %c0_i32 = arith.constant 0 : i32
    %c0_i32_0 = arith.constant 0 : i32
    %c0_i32_1 = arith.constant 0 : i32
    return %c0_i32, %c0_i32_0 : i32, i32
  }
  func.func @transform_14(%arg0: i32) -> (i32, i32) {
    %c0_i32 = arith.constant 0 : i32
    %c0_i32_0 = arith.constant 0 : i32
    %c0_i32_1 = arith.constant 0 : i32
    return %c0_i32, %c0_i32_0 : i32, i32
  }
  func.func @transform_15(%arg0: i32) -> (i32, i32) {
    %c0_i32 = arith.constant 0 : i32
    %c0_i32_0 = arith.constant 0 : i32
    %c0_i32_1 = arith.constant 0 : i32
    return %c0_i32, %c0_i32_0 : i32, i32
  }
  func.func @transform_16(%arg0: i32) -> (i32, i32) {
    %c0_i32 = arith.constant 0 : i32
    %c0_i32_0 = arith.constant 0 : i32
    %c0_i32_1 = arith.constant 0 : i32
    return %c0_i32, %c0_i32_0 : i32, i32
  }
  func.func @transform_17(%arg0: i32) -> (i32, i32, i32) {
    %c0_i32 = arith.constant 0 : i32
    %c0_i32_0 = arith.constant 0 : i32
    %c0_i32_1 = arith.constant 0 : i32
    return %arg0, %c0_i32, %c0_i32_0 : i32, i32, i32
  }
}

</mosaic_0001>

<bundles_post_ra>
// kernel: appearance_stream.1
= control target key start
LH: loop header
LB: loop body
LE: loop exit
PB: predicated region body
PF: predicated region fallthrough
CT: control target
= control target key end

     0   :  { %s4167_s0 = inlined_call_operand.vmem [shape: bf16[32,256], index: 0, kind: input, shape index: {}]   ;;  %s4168_s1 = inlined_call_operand.vmem [shape: f32[16,128], index: 1, kind: input, shape index: {}]   ;;  %s4169_s2 = inlined_call_operand.vmem [shape: bf16[16,256], index: 2, kind: input, shape index: {}]   ;;  %s4170_s3 = inlined_call_operand.vmem [shape: bf16[256,16], index: 3, kind: input, shape index: {}]   ;;  %s4171_s4 = inlined_call_operand.vmem [shape: bf16[16,16], index: 4, kind: input, shape index: {}]   ;;  %s4172_s5 = inlined_call_operand.vmem [shape: f32[16,16], index: 5, kind: input, shape index: {}]   ;;  %s4173_s6 = inlined_call_operand.vmem [shape: f32[16,16], index: 6, kind: input, shape index: {}]   ;;  %s4174_s7 = inlined_call_operand.vmem [shape: bf16[1,16], index: 7, kind: input, shape index: {}]   ;;  %s4175_s8 = inlined_call_operand.vmem [shape: bf16[256,128], index: 8, kind: input, shape index: {}]   ;;  %s4176_s9 = inlined_call_operand.vmem [shape: f32[1,128], index: 9, kind: input, shape index: {}]   ;;  %s4177_s10 = inlined_call_operand.vmem [shape: bf16[128,256], index: 10, kind: input, shape index: {}]   ;;  %s4178_s11 = inlined_call_operand.<no memory space> [shape: f32[1,1], index: 11, kind: input, shape index: {}]   ;;  %s4179_s12 = inlined_call_operand.vmem [shape: bf16[128,768], index: 12, kind: input, shape index: {}]   ;;  %s4180_s13 = inlined_call_operand.vmem [shape: f32[1,256], index: 13, kind: input, shape index: {}]   ;;  %s4181_s14 = inlined_call_operand.vmem [shape: bf16[128,384], index: 14, kind: input, shape index: {}]   ;;  %s4182_s15 = inlined_call_operand.vmem [shape: f32[1,512], index: 15, kind: input, shape index: {}]   ;;  %s4183_s16 = inlined_call_operand.vmem [shape: f32[1,512], index: 16, kind: input, shape index: {}]   ;;  %s4184_s17 = inlined_call_operand.hbm [shape: f32[2,1,128], index: 17, kind: output, shape index: {}]  }
   0x1   :  { %4191 = sst [smem:[#allocation11_spill]] %s4167_s0  ;;  %v22_v0 = vstv %s4178_s11 }
   0x2   :  { %4192 = sst [smem:[#allocation12_spill]] %s4168_s1  ;;  %23 = vst [vmem:[#allocation2] sm:$0x1] %v22_v0 }
   0x3   :  { %24 = vsyncpa [#allocation4], 0 }
   0x4   :  { %26 = vsyncpa [#allocation4 + $0x1], 0  ;;  %s3508_s26 = smov 0   ;;  %s3510_s27 = smov 0  }
   0x5   :  { %s3512_s28 = smov 0   ;;  %s3514_s29 = smov 0  }
   0x6 LB: > { %4193 = sst [smem:[#allocation6_spill]] %s3394_s26  ;;  %s3529_s11 = sadd.s32 4294967295, %s3406_s29   ;;  %s3406_s29 = sphi %s3514_s29, %s4204_s29   ;;  %s3402_s28 = sphi %s3512_s28, %s4206_s28   ;;  %s3398_s27 = sphi %s3510_s27, %s4208_s27   ;;  %s3394_s26 = sphi %s3508_s26, %s4207_s26  }
   0x7   : > { %4194 = sst [smem:[#allocation7_spill]] %s3402_s28  ;;  %s2709_s0 = sadd.s32 4294967294, %s3406_s29  }
   0x8   : > { %s3533_s30 = sadd.s32 1, %s3406_s29   ;;  %s401_s18 = sadd.s32 1, %s3402_s28 }
   0x9   : > { %4195 = sst [smem:[#allocation8_spill]] %s3533_s30  ;;  %s398_s19 = ssub.s32 %s3406_s29, %s3533_s30 }
   0xa   : > { %p411_p0 = scmp.ne.s32.totalorder %s3402_s28, %s3398_s27  ;;  %p399_p1 = scmp.eq.s32.totalorder %s398_s19, 0 }
   0xb   : > { %p412_p2 = scmp.eq.s32.totalorder %s3529_s11, 1  ;;  %p417_p3 = scmp.ne.s32.totalorder %s3398_s27, %s3394_s26 }
   0xc   : > { %p418_p4 = scmp.eq.s32.totalorder %s2709_s0, 1  ;;  %p2712_p7 = scmp.ge.s32.totalorder %s3406_s29, 1 }
   0xd   : > { %s3544_s1 = scalar_select %p399_p1, %s3402_s28, %s401_s18  }
   0xe   : > { %p3546_p5 = por %p412_p2, %p411_p0  ;;  %p3550_p6 = por %p418_p4, %p417_p3 }
   0xf   : > { %4196 = sst [smem:[#allocation9_spill]] %s3544_s1  ;;  %p494_p8 = scmp.lt.s32.totalorder %s3406_s29, 3 }
  0x10   : > { %s4198_s21 = scalar_select %p3550_p6, 1, 0 }
  0x11   : > { %p495_p9 = pnand %p2712_p7, %p494_p8 }
  0x12   : > { %4199 = sst [smem:[#allocation10_spill]] %s4198_s21  ;;  %s2713_s24 = sshll.u32 (!%p495_p9), %s3529_s11, 1 }
  0x13   : > { %498 = sbr.rel (%p495_p9) target bundleno = 4172 (0x104c), region = 88  ;;  %p547_p10 = scmp.lt.s32.totalorder (!%p495_p9), %s2713_s24, 3 }
  0x14   : > { %s4200_s25 = sld [smem:[#allocation11_spill]] (!%p495_p9)  ;;  %s3412_s21 = smov (!%p495_p9), 64  }
  0x15   : > { %s3413_s30 = smov (!%p495_p9), 32   ;;  %s2866_s0 = sshll.u32 (!%p495_p9), %s3529_s11, 4 }
  0x16   : > { %s3414_s11 = smov (!%p495_p9), [#allocation3]  }
  0x18   : > { %v3139_v1 = vld [vmem:[%s4175_s8 + $0x78] sm:$0xff]   ;;  %v3141_v3 = vld [vmem:[%s4175_s8 + $0x70] sm:$0xff]   ;;  %v3143_v5 = vld [vmem:[%s4175_s8 + $0x68] sm:$0xff]   ;;  %s4210_s24 = smov (!%p547_p10, %s2713_s24), 3  ;;  %v3408_v35 = vmov 0   ;;  %vm3410_vm0 = vmmov 0  }
  0x19   : > { %v3140_v2 = vld [vmem:[%s4175_s8 + $0x38] sm:$0xff]   ;;  %2870 = vmatprep.subr.bf16.mxu0 %v3139_v1  ;;  %v3142_v4 = vld [vmem:[%s4175_s8 + $0x30] sm:$0xff]   ;;  %v3144_v6 = vld [vmem:[%s4175_s8 + $0x28] sm:$0xff]   ;;  %s2869_s19 = sshll.u32 %s4210_s24, 3  ;;  %871 = vmatprep.mubr.bf16.mxu1 %v3408_v35  ;;  %vm1075_vm1 = vcmask 130048   ;;  %vm1688_vm2 = vcmask 261120   ;;  %s4126_s24 = scalar_lea.hbm %s4184_s17, %s2866_s0 }
  0x1a   : > { %2871 = vmatpush3.bf16.msra.mxu0 %v3140_v2  ;;  %v3145_v7 = vld [vmem:[%s4175_s8 + $0x60] sm:$0xff]   ;;  %v3147_v9 = vld [vmem:[%s4175_s8 + $0x58] sm:$0xff]   ;;  %s3587_s26 = scalar_lea.vmem %s4200_s25, %s2869_s19  ;;  %v3149_v11 = vld [vmem:[%s4175_s8 + $0x50] sm:$0xff]   ;;  %3137 = vset.pattern.permute.xlu1 %v3408_v35  ;;  %s4201_s19 = sld [smem:[#allocation12_spill]] }
  0x1b   : > { %2872 = vmatprep.subr.bf16.mxu0 %v3141_v3  ;;  %v3146_v8 = vld [vmem:[%s4175_s8 + $0x20] sm:$0xff]   ;;  %v3148_v10 = vld [vmem:[%s4175_s8 + $0x18] sm:$0xff]   ;;  %v3150_v15 = vld [vmem:[%s4175_s8 + $0x10] sm:$0xff]   ;;  %3138 = vset.pattern.permute.xlu0 %v3408_v35 }
  0x1c   : > { %v3157_v12 = vld [vmem:[%s3587_s26 + $0x4] ss:$8 sps:$4 sm:$0xff]   ;;  %v3158_v13 = vld [vmem:[%s4177_s10 + $0x74] ss:$8 sps:$4 sm:$0xff]   ;;  %v3160_v14 = vld [vmem:[%s4177_s10 + $0x70] ss:$8 sps:$4 sm:$0xff]  }
  0x1d   : > { %733 = vmatprep.mubr.bf16.mxu0 %v3157_v12  ;;  %v3161_v16 = vld [vmem:[%s4177_s10 + $0x64] ss:$8 sps:$4 sm:$0xff]   ;;  %839 = vmatprep.subr.bf16.mxu1 %v3158_v13  ;;  %v3163_v18 = vld [vmem:[%s4177_s10 + $0x60] ss:$8 sps:$4 sm:$0xff]   ;;  %v3164_v20 = vld [vmem:[%s4177_s10 + $0x54] ss:$8 sps:$4 sm:$0xff]  }
  0x1e   : > { %2873 = vmatpush3.bf16.msra.mxu0 %v3142_v4  ;;  %v3151_v17 = vld [vmem:[%s4175_s8 + $0x48] sm:$0xff]   ;;  %840 = vmatpush1.bf16.msra.mxu1 %v3160_v14  ;;  %v3153_v21 = vld [vmem:[%s4175_s8 + $0x40] sm:$0xff]   ;;  %v3166_v22 = vld [vmem:[%s4177_s10 + $0x50] ss:$8 sps:$4 sm:$0xff]  }
  0x1f   : > { %2874 = vmatprep.subr.bf16.mxu0 %v3143_v5  ;;  %v3152_v19 = vld [vmem:[%s4175_s8 + $0x8] sm:$0xff]   ;;  %841 = vmatprep.subr.bf16.mxu1 %v3161_v16  ;;  %v3154_v24 = vld [vmem:[%s4175_s8] sm:$0xff]   ;;  %v3170_v27 = vld [vmem:[%s4177_s10 + $0x34] ss:$8 sps:$4 sm:$0xff]  }
  0x20   : > { %v3167_v23 = vld [vmem:[%s4177_s10 + $0x44] ss:$8 sps:$4 sm:$0xff]   ;;  %v3169_v25 = vld [vmem:[%s4177_s10 + $0x40] ss:$8 sps:$4 sm:$0xff]   ;;  %v3172_v28 = vld [vmem:[%s4177_s10 + $0x30] ss:$8 sps:$4 sm:$0xff]  }
  0x21   : > { %v3155_v26 = vld [vmem:[%s3587_s26] ss:$8 sps:$4 sm:$0xff]   ;;  %v3173_v29 = vld [vmem:[%s4177_s10 + $0x24] ss:$8 sps:$4 sm:$0xff]   ;;  %v3176_v31 = vld [vmem:[%s4177_s10 + $0x14] ss:$8 sps:$4 sm:$0xff]  }
  0x22   : > { %2875 = vmatpush3.bf16.msra.mxu0 %v3144_v6  ;;  %842 = vmatpush1.bf16.msra.mxu1 %v3163_v18  ;;  %v3175_v30 = vld [vmem:[%s4177_s10 + $0x20] ss:$8 sps:$4 sm:$0xff]   ;;  %v3178_v32 = vld [vmem:[%s4177_s10 + $0x10] ss:$8 sps:$4 sm:$0xff]   ;;  %v3179_v33 = vld [vmem:[%s4177_s10 + $0x4] ss:$8 sps:$4 sm:$0xff]  }
  0x23   : > { %2876 = vmatprep.subr.bf16.mxu0 %v3145_v7  ;;  %843 = vmatprep.subr.bf16.mxu1 %v3164_v20  ;;  %v3181_v34 = vld [vmem:[%s4177_s10] ss:$8 sps:$4 sm:$0xff]   ;;  %v3182_v36 = vld [vmem:[%s4170_s3 + $0x78] sm:$0xff]   ;;  %v3184_v38 = vld [vmem:[%s4170_s3 + $0x70] sm:$0xff]   ;;  %s3411_s26 = smov 96  }
  0x24   : > { %v3183_v37 = vld [vmem:[%s4170_s3 + $0x38] sm:$0xff]   ;;  %v3185_v39 = vld [vmem:[%s4170_s3 + $0x30] sm:$0xff]   ;;  %v3186_v40 = vld [vmem:[%s4170_s3 + $0x68] sm:$0xff]  }
  0x25   : > { %v3187_v41 = vld [vmem:[%s4170_s3 + $0x28] sm:$0xff]   ;;  %v3188_v42 = vld [vmem:[%s4170_s3 + $0x60] sm:$0xff]   ;;  %v3190_v44 = vld [vmem:[%s4170_s3 + $0x58] sm:$0xff]  }
  0x26   : > { %2877 = vmatpush3.bf16.msra.mxu0 %v3146_v8  ;;  %844 = vmatpush1.bf16.msra.mxu1 %v3166_v22  ;;  %v3189_v43 = vld [vmem:[%s4170_s3 + $0x20] sm:$0xff]   ;;  %v3191_v45 = vld [vmem:[%s4170_s3 + $0x18] sm:$0xff]   ;;  %v3192_v56 = vld [vmem:[%s4170_s3 + $0x50] sm:$0xff]   ;;  %v3409_v8 = vmov 0.0  }
  0x27   : > { %2878 = vmatprep.subr.bf16.mxu0 %v3147_v9  ;;  %845 = vmatprep.subr.bf16.mxu1 %v3167_v23  ;;  %v2716_v50 = vld [vmem:[%s4176_s9] ss:$0 sm:$0xff]  ;;  %v3193_v57 = vld [vmem:[%s4170_s3 + $0x10] sm:$0xff]   ;;  %v3196_v58 = vld [vmem:[%s4170_s3 + $0x48] sm:$0xff]  }
  0x28   : > { %v3197_v59 = vld [vmem:[%s4170_s3 + $0x8] sm:$0xff]   ;;  %v3199_v60 = vld [vmem:[%s4170_s3 + $0x40] sm:$0xff]  }
  0x29   : > { %v3200_v61 = vld [vmem:[%s4170_s3] sm:$0xff]   ;;  %v1140_v18 = vld [vmem:[%s4201_s19 + $0x8] sm:$0xff] }
  0x2a   : > { %2879 = vmatpush3.bf16.msra.mxu0 %v3148_v10  ;;  %846 = vmatpush1.bf16.msra.mxu1 %v3169_v25  ;;  %v3198_v1 = vld [vmem:[%s4169_s2 + $0x4] ss:$8 sps:$4 sm:$0xff]   ;;  %v3194_v3 = vld [vmem:[%s4169_s2] ss:$8 sps:$4 sm:$0xff]  }
  0x2b   : > { %2880 = vmatprep.subr.bf16.mxu0 %v3149_v11  ;;  %847 = vmatprep.subr.bf16.mxu1 %v3170_v27  ;;  %v3201_v16 = vld [vmem:[%s4171_s4] sm:$0xff]   ;;  %v1121_v20 = vld [vmem:[%s4172_s5 + $0x8] sm:$0xff] }
  0x2e   : > { %2881 = vmatpush3.bf16.msra.mxu0 %v3150_v15  ;;  %848 = vmatpush1.bf16.msra.mxu1 %v3172_v28 }
  0x2f   : > { %2882 = vmatprep.subr.bf16.mxu0 %v3151_v17  ;;  %849 = vmatprep.subr.bf16.mxu1 %v3173_v29  ;;  %v1120_v17 = vld [vmem:[%s4172_s5] sm:$0xff]  ;;  %v3202_v29 = vld [vmem:[%s4179_s12 + $0x150] ss:$24 sps:$4 sm:$0xff]  }
  0x32   : > { %2883 = vmatpush3.bf16.msra.mxu0 %v3152_v19  ;;  %850 = vmatpush1.bf16.msra.mxu1 %v3175_v30  ;;  %v1139_v19 = vld [vmem:[%s4201_s19] sm:$0xff]  ;;  %v3204_v30 = vld [vmem:[%s4179_s12 + $0x154] ss:$24 sps:$4 sm:$0xff]  }
  0x33   : > { %2884 = vmatprep.subr.bf16.mxu0 %v3153_v21  ;;  %851 = vmatprep.subr.bf16.mxu1 %v3176_v31  ;;  %v3205_v31 = vld [vmem:[%s4179_s12 + $0x158] ss:$24 sps:$4 sm:$0xff]  }
  0x36   : > { %2885 = vmatpush3.bf16.msra.mxu0 %v3154_v24  ;;  %852 = vmatpush1.bf16.msra.mxu1 %v3178_v32  ;;  %v3207_v32 = vld [vmem:[%s4179_s12 + $0x15c] ss:$24 sps:$4 sm:$0xff]  }
  0x37   : > { %853 = vmatprep.subr.bf16.mxu1 %v3179_v33  ;;  %2892 = vmatprep.subr.bf16.mxu0 %v3182_v36  ;;  %v3210_v33 = vld [vmem:[%s4179_s12 + $0x124] ss:$24 sps:$4 sm:$0xff]   ;;  %v3208_v36 = vld [vmem:[%s4179_s12 + $0x120] ss:$24 sps:$4 sm:$0xff]  }
  0x39   : > { %734 = vmatmul.mubr.bf16.vlgmr.msra.gmra.mxu0 %v3155_v26 }
  0x3a   : > { %854 = vmatpush1.bf16.msra.mxu1 %v3181_v34  ;;  %2893 = vmatpush3.bf16.msra.mxu0 %v3183_v37  ;;  %v3213_v34 = vld [vmem:[%s4179_s12 + $0x12c] ss:$24 sps:$4 sm:$0xff]   ;;  %v3211_v37 = vld [vmem:[%s4179_s12 + $0x128] ss:$24 sps:$4 sm:$0xff]  }
  0x3b   : > { %2894 = vmatprep.subr.bf16.mxu0 %v3184_v38  ;;  %2971 = vmatprep.subr.mxu1 %v1140_v18  ;;  %v3216_v38 = vld [vmem:[%s4179_s12 + $0xf4] ss:$24 sps:$4 sm:$0xff]  }
  0x3e   : > { %2895 = vmatpush3.bf16.msra.mxu0 %v3185_v39  ;;  %v3219_v39 = vld [vmem:[%s4179_s12 + $0xfc] ss:$24 sps:$4 sm:$0xff]  }
  0x3f   : > { %2896 = vmatprep.subr.bf16.mxu0 %v3186_v40  ;;  %v3214_v40 = vld [vmem:[%s4179_s12 + $0xf0] ss:$24 sps:$4 sm:$0xff]  }
  0x42   : > { %2897 = vmatpush3.bf16.msra.mxu0 %v3187_v41  ;;  %v3217_v41 = vld [vmem:[%s4179_s12 + $0xf8] ss:$24 sps:$4 sm:$0xff]  }
  0x43   : > { %2898 = vmatprep.subr.bf16.mxu0 %v3188_v42  ;;  %v3222_v42 = vld [vmem:[%s4179_s12 + $0xc4] ss:$24 sps:$4 sm:$0xff]  }
  0x46   : > { %2899 = vmatpush3.bf16.msra.mxu0 %v3189_v43  ;;  %v3225_v43 = vld [vmem:[%s4179_s12 + $0xcc] ss:$24 sps:$4 sm:$0xff]  }
  0x47   : > { %2900 = vmatprep.subr.bf16.mxu0 %v3190_v44  ;;  %v3220_v44 = vld [vmem:[%s4179_s12 + $0xc0] ss:$24 sps:$4 sm:$0xff]  }
  0x4a   : > { %2901 = vmatpush3.bf16.msra.mxu0 %v3191_v45  ;;  %v3223_v45 = vld [vmem:[%s4179_s12 + $0xc8] ss:$24 sps:$4 sm:$0xff]  }
  0x4b   : > { %2902 = vmatprep.subr.bf16.mxu0 %v3192_v56  ;;  %v2771_v56 = vld [vmem:[#allocation2] ss:$0 sm:$0xff] }
  0x4e   : > { %2903 = vmatpush3.bf16.msra.mxu0 %v3193_v57 }
  0x4f   : > { %2904 = vmatprep.subr.bf16.mxu0 %v3196_v58 }
  0x52   : > { %2905 = vmatpush3.bf16.msra.mxu0 %v3197_v59 }
  0x53   : > { %2906 = vmatprep.subr.bf16.mxu0 %v3199_v60 }
  0x56   : > { %2907 = vmatpush3.bf16.msra.mxu0 %v3200_v61 }
  0x57   : > { %2965 = vmatprep.subr.bf16.mxu0 %v3409_v8 }
  0xf9   : > { %v2886_v46 = vpop.f32.mrf.mxu0 }
  0xfb   : > { %v2887_v47 = vpop.f32.mrf.mxu0 }
  0xfc   : > { %v2888_v49 = vadd.f32 %v2887_v47, %v2886_v46  ;;  %v3228_v46 = vld [vmem:[%s4179_s12 + $0x94] ss:$24 sps:$4 sm:$0xff]  }
  0xfd   : > { %v2889_v48 = vpop.f32.mrf.mxu0  ;;  %v3231_v47 = vld [vmem:[%s4179_s12 + $0x9c] ss:$24 sps:$4 sm:$0xff]  }
  0xfe   : > { %v3696_v53 = vadd.f32 %v2888_v49, %v2716_v50  ;;  %v3229_v49 = vld [vmem:[%s4179_s12 + $0x98] ss:$24 sps:$4 sm:$0xff]  }
  0xff   : > { %v2890_v51 = vpop.f32.mrf.mxu0 }
 0x100   : > { %v2891_v52 = vadd.f32 %v2890_v51, %v2889_v48  ;;  %v3226_v48 = vld [vmem:[%s4179_s12 + $0x90] ss:$24 sps:$4 sm:$0xff]   ;;  %v3237_v51 = vld [vmem:[%s4179_s12 + $0x6c] ss:$24 sps:$4 sm:$0xff]  }
 0x102   : > { %v3698_v54 = vadd.f32 %v2891_v52, %v2716_v50  ;;  %v3234_v50 = vld [vmem:[%s4179_s12 + $0x64] ss:$24 sps:$4 sm:$0xff]   ;;  %v3232_v52 = vld [vmem:[%s4179_s12 + $0x60] ss:$24 sps:$4 sm:$0xff]  }
 0x104   : > { %v742_v55 = vpack.c.bf16 %v3698_v54, %v3696_v53 }
 0x106   : > { %872 = vmatmul.mubr.bf16.vlgmr.msra.gmra.mxu1 %v742_v55  ;;  %v3235_v55 = vld [vmem:[%s4179_s12 + $0x68] ss:$24 sps:$4 sm:$0xff]  }
 0x107   : > { %2975 = vmatprep.mubr.msk.f32.mxu1 %vm1075_vm1, %v1120_v17  ;;  %2972 = vmatpush3.msra.mxu1 %v1140_v18 }
 0x108   : > { %2973 = vmatprep.subr.mxu1 %v1139_v19 }
 0x109   : > { %2974 = vmatpush3.msra.mxu1 %v1139_v19 }
 0x10a   : > { %1537 = vmatprep.subr.bf16.mxu1 %v3204_v30  ;;  %v3267_v30 = vld [vmem:[%s4179_s12 + $0x74] ss:$24 sps:$4 sm:$0xff]  }
 0x10e   : > { %2976 = vmatmul.mubr.msk.f32.vlgmr.msra.gmra.mxu1 %vm1075_vm1, %v1121_v20 }
 0x10f   : > { %1569 = vmatprep.mubr.bf16.mxu1 %v3408_v35  ;;  %1538 = vmatpush1.bf16.msra.mxu1 %v3202_v29  ;;  %v3262_v29 = vld [vmem:[%s4179_s12 + $0xa0] ss:$24 sps:$4 sm:$0xff]  }
 0x110   : > { %1539 = vmatprep.subr.bf16.mxu1 %v3210_v33  ;;  %v3268_v33 = vld [vmem:[%s4179_s12 + $0x40] ss:$24 sps:$4 sm:$0xff]  }
 0x113   : > { %1540 = vmatpush1.bf16.msra.mxu1 %v3208_v36  ;;  %v3271_v36 = vld [vmem:[%s4179_s12 + $0x10] ss:$24 sps:$4 sm:$0xff]  }
 0x114   : > { %1541 = vmatprep.subr.bf16.mxu1 %v3216_v38 }
 0x117   : > { %1542 = vmatpush1.bf16.msra.mxu1 %v3214_v40 }
 0x118   : > { %1543 = vmatprep.subr.bf16.mxu1 %v3222_v42  ;;  %v2825_v42 = vld [vmem:[%s4180_s13 + $0x1] ss:$0 sm:$0xff] }
 0x11b   : > { %1544 = vmatpush1.bf16.msra.mxu1 %v3220_v44 }
 0x11c   : > { %1545 = vmatprep.subr.bf16.mxu1 %v3228_v46 }
 0x11f   : > { %1546 = vmatpush1.bf16.msra.mxu1 %v3226_v48 }
 0x120   : > { %1547 = vmatprep.subr.bf16.mxu1 %v3234_v50 }
 0x123   : > { %1548 = vmatpush1.bf16.msra.mxu1 %v3232_v52 }
 0x1c6   : > { %v873_v62 = vpop.f32.mrf.mxu1 }
 0x1c8   : > { %v875_v63 = vpop.f32.mrf.mxu1 }
 0x1ca   : > { %v877_v0 = vpop.f32.mrf.mxu1 }
 0x1cb   : > { %v882_v2 = vpack.c.bf16 %v877_v0, %v873_v62 }
 0x1cc   : > { %v879_v4 = vpop.f32.mrf.mxu1 }
 0x1cd   : > { %v883_v5 = vpack.c.bf16 %v879_v4, %v875_v63  ;;  %v896_v7 = vmul.bf16 %v3194_v3, %v882_v2  ;;  %v3240_v3 = vld [vmem:[%s4179_s12 + $0x34] ss:$24 sps:$4 sm:$0xff]   ;;  %v3238_v4 = vld [vmem:[%s4179_s12 + $0x30] ss:$24 sps:$4 sm:$0xff]  }
 0x1ce   : > { %1549 = vmatprep.subr.bf16.mxu1 %v3240_v3 }
 0x1cf   : > { %v897_v6 = vmul.bf16 %v3198_v1, %v883_v5  ;;  %v3243_v5 = vld [vmem:[%s4179_s12 + $0x3c] ss:$24 sps:$4 sm:$0xff]   ;;  %1550 = vmatpush1.bf16.msra.mxu1 %v3238_v4 }
 0x1d1   : > { %1058 = vmatprep.mubr.bf16.mxu0 %v897_v6  ;;  %v3241_v6 = vld [vmem:[%s4179_s12 + $0x38] ss:$24 sps:$4 sm:$0xff]  }
 0x1d2   : > { %1059 = vmatmul.mubr.bf16.vlgmr.msra.gmra.mxu0 %v896_v7 }
 0x1d3   : > { %2967 = vmatprep.mubr.msk.bf16.mxu0 %vm3410_vm0, %v3409_v8 }
 0x292   : > { %v2908_v9 = vpop.f32.mrf.mxu0 }
 0x294   : > { %v2909_v10 = vpop.f32.mrf.mxu0 }
 0x295   : > { %v2910_v13 = vadd.f32 %v2909_v10, %v2908_v9  ;;  %v3246_v9 = vld [vmem:[%s4179_s12 + $0x4] ss:$24 sps:$4 sm:$0xff]   ;;  %v3244_v10 = vld [vmem:[%s4179_s12] ss:$24 sps:$4 sm:$0xff]  }
 0x296   : > { %v2911_v11 = vpop.f32.mrf.mxu0  ;;  %1551 = vmatprep.subr.bf16.mxu1 %v3246_v9 }
 0x297   : > { %1552 = vmatpush1.bf16.msra.mxu1 %v3244_v10 }
 0x298   : > { %v2912_v12 = vpop.f32.mrf.mxu0 }
 0x299   : > { %v2913_v14 = vadd.f32 %v2912_v12, %v2911_v11  ;;  %v3249_v11 = vld [vmem:[%s4179_s12 + $0xc] ss:$24 sps:$4 sm:$0xff]   ;;  %v3247_v12 = vld [vmem:[%s4179_s12 + $0x8] ss:$24 sps:$4 sm:$0xff]  }
 0x29b   : > { %v1069_v15 = vpack.c.bf16 %v2913_v14, %v2910_v13  ;;  %v3252_v14 = vld [vmem:[%s4179_s12 + $0x164] ss:$24 sps:$4 sm:$0xff]  }
 0x29c   : > { %1623 = vmatprep.subr.bf16.mxu1 %v3252_v14 }
 0x29d   : > { %2966 = vmatpush3.bf16.msra.mxu0 %v1069_v15  ;;  %v2977_v15 = vpop.f32.mrf.mxu1 }
 0x29e   : > { %1580 = vmatprep.subr.bf16.mxu0 %v3207_v32  ;;  %v3270_v32 = vld [vmem:[%s4179_s12 + $0x44] ss:$24 sps:$4 sm:$0xff]  }
 0x29f   : > { %v1213_v18 = vpop.f32.mrf.mxu1 }
 0x2a0   : > { %2968 = vmatmul.mubr.msk.bf16.vlgmr.msra.gmra.mxu0 %vm1075_vm1, %v3201_v16 }
 0x2a1   : > { %1612 = vmatprep.mubr.bf16.mxu0 %v3408_v35  ;;  %1581 = vmatpush1.bf16.msra.mxu0 %v3205_v31  ;;  %v3265_v31 = vld [vmem:[%s4179_s12 + $0x70] ss:$24 sps:$4 sm:$0xff]  }
 0x2a2   : > { %1582 = vmatprep.subr.bf16.mxu0 %v3213_v34  ;;  %v3273_v34 = vld [vmem:[%s4179_s12 + $0x14] ss:$24 sps:$4 sm:$0xff]  }
 0x2a5   : > { %1583 = vmatpush1.bf16.msra.mxu0 %v3211_v37 }
 0x2a6   : > { %1584 = vmatprep.subr.bf16.mxu0 %v3219_v39  ;;  %v2824_v39 = vld [vmem:[%s4180_s13] ss:$0 sm:$0xff] }
 0x2a9   : > { %1585 = vmatpush1.bf16.msra.mxu0 %v3217_v41 }
 0x2aa   : > { %1586 = vmatprep.subr.bf16.mxu0 %v3225_v43 }
 0x2ad   : > { %1587 = vmatpush1.bf16.msra.mxu0 %v3223_v45 }
 0x2ae   : > { %1588 = vmatprep.subr.bf16.mxu0 %v3231_v47 }
 0x2b1   : > { %1589 = vmatpush1.bf16.msra.mxu0 %v3229_v49 }
 0x2b2   : > { %1590 = vmatprep.subr.bf16.mxu0 %v3237_v51 }
 0x2b5   : > { %1591 = vmatpush1.bf16.msra.mxu0 %v3235_v55 }
 0x2b6   : > { %1592 = vmatprep.subr.bf16.mxu0 %v3243_v5 }
 0x2b9   : > { %1593 = vmatpush1.bf16.msra.mxu0 %v3241_v6  ;;  %v3938_v6 = vld [vmem:[%s4173_s6 + $0x8] sm:$0xff] }
 0x2ba   : > { %1594 = vmatprep.subr.bf16.mxu0 %v3249_v11 }
 0x2bd   : > { %1595 = vmatpush1.bf16.msra.mxu0 %v3247_v12 }
 0x2be   : > { %2978 = vmatprep.subr.bf16.mxu0 %v3409_v8 }
 0x360   : > { %v1113_v21 = vpop.f32.mrf.mxu0 }
 0x361   : > { %v1122_v22 = vmul.f32 %v1120_v17, %v1113_v21 }
 0x362   : > { %v2969_v23 = vpop.f32.mrf.mxu0 }
 0x363   : > { %v1124_v24 = vsel %vm1075_vm1, %v1122_v22, 0.0  ;;  %v3250_v23 = vld [vmem:[%s4179_s12 + $0x160] ss:$24 sps:$4 sm:$0xff]  }
 0x364   : > { %1125 = vadd.xlane.f32.xlu0 %v1124_v24  ;;  %v1116_v25 = vpop.f32.mrf.mxu0 }
 0x365   : > { %v1123_v26 = vmul.f32 %v1121_v20, %v1116_v25  ;;  %v3255_v25 = vld [vmem:[%s4179_s12 + $0x134] ss:$24 sps:$4 sm:$0xff]  }
 0x366   : > { %v2970_v27 = vpop.f32.mrf.mxu0 }
 0x367   : > { %v1127_v28 = vsel %vm1075_vm1, %v1123_v26, 0.0  ;;  %v3256_v26 = vld [vmem:[%s4179_s12 + $0x100] ss:$24 sps:$4 sm:$0xff]   ;;  %v3261_v27 = vld [vmem:[%s4179_s12 + $0xd4] ss:$24 sps:$4 sm:$0xff]  }
 0x368   : > { %1128 = vadd.xlane.f32.xlu0 %v1127_v28  ;;  %v3264_v28 = vld [vmem:[%s4179_s12 + $0xa4] ss:$24 sps:$4 sm:$0xff]  }
 0x3ed   : > { %v1126_v57 = vpop.xlane.xlu0 %1125 }
 0x3ee   : > { %v1137_v58 = vadd.f32 %v2771_v56, %v1126_v57 }
 0x3f0   : > { %v2774_v59 = vmul.f32 -1.442695, %v1137_v58 }
 0x3f1   : > { %v1129_v60 = vpop.xlane.xlu0 %1128 }
 0x3f2   : > { %3298 = vpow2.f32 %v2774_v59  ;;  %v1138_v61 = vadd.f32 %v2771_v56, %v1129_v60 }
 0x3f4   : > { %v2775_v62 = vmul.f32 -1.442695, %v1138_v61 }
 0x3f6   : > { %3300 = vpow2.f32 %v2775_v62 }
 0x3ff   : > { %v3299_v63 = vpop.eup %3298 }
 0x400   : > { %v1228_v0 = vadd.f32 1.0, %v3299_v63 }
 0x402   : > { %3302 = vrcp.f32 %v1228_v0 }
 0x403   : > { %v3301_v1 = vpop.eup %3300 }
 0x404   : > { %v1229_v2 = vadd.f32 1.0, %v3301_v1  ;;  %v3931_v1 = vld [vmem:[%s4173_s6] sm:$0xff] }
 0x406   : > { %3304 = vrcp.f32 %v1229_v2 }
 0x40f   : > { %v3303_v7 = vpop.eup %3302 }
 0x410   : > { %1236 = vperm.xlu1 %3137, %v3303_v7  }
 0x413   : > { %v3305_v13 = vpop.eup %3304 }
 0x414   : > { %1241 = vperm.xlu1 %3137, %v3305_v13  }
 0x48b   : > { %v1237_v16 = vpop.permute.xlu1 %1236 }
 0x48c   : > { %v1244_v17 = vmul.f32 %v1237_v16, %v3696_v53  ;;  %v3253_v53 = vld [vmem:[%s4179_s12 + $0x130] ss:$24 sps:$4 sm:$0xff]  }
 0x48e   : > { %v3853_v21 = vadd.f32 %v1244_v17, %v1213_v18 }
 0x48f   : > { %v1242_v19 = vpop.permute.xlu1 %1241 }
 0x490   : > { %v1245_v20 = vmul.f32 %v1242_v19, %v3698_v54  ;;  %v3258_v54 = vld [vmem:[%s4179_s12 + $0x104] ss:$24 sps:$4 sm:$0xff]  }
 0x492   : > { %v3855_v22 = vadd.f32 %v2977_v15, %v1245_v20 }
 0x494   : > { %v1248_v24 = vpack.c.bf16 %v3855_v22, %v3853_v21 }
 0x496   : > { %1570 = vmatmul.mubr.bf16.vlgmr.msra.gmra.mxu1 %v1248_v24  ;;  %1613 = vmatmul.mubr.bf16.vlgmr.msra.gmra.mxu0 %v1248_v24 }
 0x497   : > { %1624 = vmatpush1.bf16.msra.mxu1 %v3250_v23  ;;  %1655 = vmatprep.mubr.bf16.mxu1 %v3408_v35  ;;  %v3259_v35 = vld [vmem:[%s4179_s12 + $0xd0] ss:$24 sps:$4 sm:$0xff]  }
 0x498   : > { %1625 = vmatprep.subr.bf16.mxu1 %v3255_v25  ;;  %2980 = vmatprep.mubr.msk.bf16.mxu0 %vm3410_vm0, %v3409_v8 }
 0x49b   : > { %1626 = vmatpush1.bf16.msra.mxu1 %v3253_v53 }
 0x49c   : > { %1627 = vmatprep.subr.bf16.mxu1 %v3258_v54 }
 0x49f   : > { %1628 = vmatpush1.bf16.msra.mxu1 %v3256_v26 }
 0x4a0   : > { %1629 = vmatprep.subr.bf16.mxu1 %v3261_v27 }
 0x4a3   : > { %1630 = vmatpush1.bf16.msra.mxu1 %v3259_v35 }
 0x4a4   : > { %1631 = vmatprep.subr.bf16.mxu1 %v3264_v28 }
 0x4a7   : > { %1632 = vmatpush1.bf16.msra.mxu1 %v3262_v29 }
 0x4a8   : > { %1633 = vmatprep.subr.bf16.mxu1 %v3267_v30 }
 0x4ab   : > { %1634 = vmatpush1.bf16.msra.mxu1 %v3265_v31 }
 0x4ac   : > { %1635 = vmatprep.subr.bf16.mxu1 %v3270_v32 }
 0x4af   : > { %1636 = vmatpush1.bf16.msra.mxu1 %v3268_v33 }
 0x4b0   : > { %1637 = vmatprep.subr.bf16.mxu1 %v3273_v34 }
 0x4b3   : > { %1638 = vmatpush1.bf16.msra.mxu1 %v3271_v36 }
 0x4b4   : > { %2996 = vmatprep.subr.bf16.mxu1 %v3409_v8 }
 0x4b6   : > { %1656 = vmatmul.mubr.bf16.vlgmr.msra.gmra.mxu1 %v1248_v24 }
 0x4b7   : > { %2998 = vmatprep.mubr.msk.bf16.mxu1 %vm3410_vm0, %v3409_v8 }
 0x556   : > { %v1571_v37 = vpop.f32.mrf.mxu1  ;;  %v1614_v38 = vpop.f32.mrf.mxu0 }
 0x557   : > { %v1673_v45 = vadd.f32 %v2824_v39, %v1571_v37 }
 0x558   : > { %v1573_v40 = vpop.f32.mrf.mxu1  ;;  %v1616_v41 = vpop.f32.mrf.mxu0 }
 0x559   : > { %v1683_v49 = vadd.f32 %v2825_v42, %v1573_v40 }
 0x55a   : > { %v1575_v43 = vpop.f32.mrf.mxu1  ;;  %v1618_v44 = vpop.f32.mrf.mxu0 }
 0x55b   : > { %v1674_v46 = vadd.f32 %v2824_v39, %v1575_v43  ;;  %v1759_v47 = vpack.c.bf16 %v1618_v44, %v1614_v38 }
 0x55c   : > { %v1577_v48 = vpop.f32.mrf.mxu1  ;;  %v1620_v58 = vpop.f32.mrf.mxu0 }
 0x55d   : > { %v1675_v50 = vpack.c.bf16 %v1674_v46, %v1673_v45  ;;  %v1684_v51 = vadd.f32 %v2825_v42, %v1577_v48  ;;  %2997 = vmatpush3.bf16.msra.mxu1 %v1759_v47  ;;  %v1836_v59 = vpack.c.bf16 %v1620_v58, %v1616_v41 }
 0x55e   : > { %3008 = vmatprep.subr.bf16.mxu1 %v3409_v8 }
 0x55f   : > { %v1685_v52 = vpack.c.bf16 %v1684_v51, %v1683_v49  ;;  %1761 = vrot.lane.b32.xlu1 %v1675_v50, %s3411_s26 }
 0x561   : > { %1764 = vrot.lane.b32.xlu0 %v1685_v52, %s3411_s26  ;;  %v1693_v55 = vsel %vm1688_vm2, %v1685_v52, 0 }
 0x562   : > { %2979 = vmatpush3.bf16.xpose.msra.mxu0 %v1693_v55 }
 0x563   : > { %2984 = vmatprep.subr.bf16.mxu0 %v3409_v8 }
 0x569   : > { %2981 = vmatmul.mubr.msk.bf16.vlgmr.msra.gmra.mxu0 %vm1688_vm2, %v1675_v50 }
 0x56a   : > { %2986 = vmatprep.mubr.msk.bf16.mxu0 %vm3410_vm0, %v3409_v8 }
 0x5d1   : > { %v1762_v60 = vpop.permute.xlu1 %1761 }
 0x5d3   : > { %v1765_v56 = vpop.permute.xlu0 %1764 }
 0x5d4   : > { %v1770_v57 = vsel %vm1688_vm2, %v1765_v56, 0 }
 0x5d5   : > { %2985 = vmatpush3.bf16.xpose.msra.mxu0 %v1770_v57 }
 0x5d6   : > { %2990 = vmatprep.subr.bf16.mxu0 %v3409_v8 }
 0x5dc   : > { %2987 = vmatmul.mubr.msk.bf16.vlgmr.msra.gmra.mxu0 %vm1688_vm2, %v1762_v60 }
 0x5dd   : > { %2991 = vmatpush3.bf16.msra.mxu0 %v1836_v59  ;;  %2992 = vmatprep.mubr.msk.bf16.mxu0 %vm3410_vm0, %v3409_v8 }
 0x5de   : > { %3002 = vmatprep.subr.bf16.mxu0 %v3409_v8 }
 0x629   : > { %v1729_v61 = vpop.f32.mrf.mxu0 }
 0x62a   : > { %v1730_v53 = vadd.f32 %v1729_v61, %v3931_v1 }
 0x62b   : > { %v2982_v62 = vpop.f32.mrf.mxu0 }
 0x62c   : > { %v1736_v54 = vsel %vm1075_vm1, %v1730_v53, -inf }
 0x62d   : > { %v1732_v63 = vpop.f32.mrf.mxu0 }
 0x62e   : > { %v1733_v12 = vadd.f32 %v1732_v63, %v3938_v6 }
 0x62f   : > { %v2983_v0 = vpop.f32.mrf.mxu0 }
 0x630   : > { %v1739_v13 = vsel %vm1075_vm1, %v1733_v12, -inf }
 0x69c   : > { %v1806_v2 = vpop.f32.mrf.mxu0 }
 0x69d   : > { %v1807_v3 = vadd.f32 %v1806_v2, %v3931_v1 }
 0x69e   : > { %v2988_v4 = vpop.f32.mrf.mxu0 }
 0x69f   : > { %v1813_v5 = vsel %vm1075_vm1, %v1807_v3, -inf }
 0x6a0   : > { %1814 = vmax.xlane.f32.xlu1 %v1813_v5  ;;  %v1809_v7 = vpop.f32.mrf.mxu0 }
 0x6a1   : > { %v1810_v9 = vadd.f32 %v1809_v7, %v3938_v6 }
 0x6a2   : > { %v2989_v10 = vpop.f32.mrf.mxu0 }
 0x6a3   : > { %v1816_v11 = vsel %vm1075_vm1, %v1810_v9, -inf }
 0x6a4   : > { %1817 = vmax.xlane.f32.xlu0 %v1816_v11 }
 0x6ba   : > { %1925 = vrot.lane.b32.xlu0 %v1675_v50, %s3412_s21 }
 0x6d9   : > { %1740 = vmax.xlane.f32.xlu0 %v1739_v13 }
 0x729   : > { %v1815_v14 = vpop.xlane.xlu1 %1814 }
 0x72a   : > { %v1819_v15 = vsub.f32 %v1807_v3, %v1815_v14 }
 0x72c   : > { %v1821_v16 = vmul.f32 1.442695, %v1819_v15 }
 0x72d   : > { %v1818_v17 = vpop.xlane.xlu0 %1817 }
 0x72e   : > { %3306 = vpow2.f32 %v1821_v16  ;;  %v1820_v18 = vsub.f32 %v1810_v9, %v1818_v17 }
 0x730   : > { %v1823_v19 = vmul.f32 1.442695, %v1820_v18 }
 0x731   : > { %v1926_v36 = vpop.permute.xlu0 %1925 }
 0x732   : > { %3308 = vpow2.f32 %v1823_v19 }
 0x73b   : > { %v3307_v20 = vpop.eup %3306 }
 0x73c   : > { %v1825_v23 = vsel %vm1075_vm1, %v3307_v20, 0.0 }
 0x73d   : > { %1826 = vadd.xlane.f32.xlu1 %v1825_v23 }
 0x73f   : > { %v3309_v24 = vpop.eup %3308 }
 0x740   : > { %v1828_v25 = vsel %vm1075_vm1, %v3309_v24, 0.0 }
 0x741   : > { %1829 = vadd.xlane.f32.xlu1 %v1828_v25 }
 0x752   : > { %1927 = vrot.lane.b32.xlu1 %v1685_v52, %s3412_s21  ;;  %s544_s21 = sand.u32 1, %s3398_s27  }
 0x753   : > { %s545_s18 = scalar_lea.vmem [#allocation3], %s544_s21  ;;  %s2642_s22 = scalar_lea.sflag [#allocation4], %s544_s21 }
 0x754   : > { %s2654_s28 = sshll.u32 %s545_s18, 4  ;;  %s4128_s28 = int_to_ptr.vmem [resolvable:$true] %s2654_s28 }
 0x755   : > { %s3346_s23 = scalar_lea.vmem %s4128_s28, 16 }
 0x756   : > { %2048 = vrot.lane.b32.xlu1 %v1685_v52, %s3413_s30  ;;  %p3347_p11 = scmp.ne.s32.totalorder %s4128_s28, %s3346_s23 }
 0x758   : > { %p3348_p12 = pnand %p3347_p11, %p3546_p5 }
 0x75a   : > { %2046 = vrot.lane.b32.xlu1 %v1675_v50, %s3413_s30  ;;  %p3349_p13 = pneg %p3348_p12  ;;  %s3350_s30 = sshll.u32 %s3414_s11, 4  ;;  %s3351_s30 = int_to_ptr.vmem [resolvable:$false] %s3350_s30 }
 0x75b   : > { %s3352_s25 = scalar_lea.vmem %s3351_s30, 32  ;;  %p3353_p0 = scmp.lt.s32.totalorder %s4128_s28, %s3351_s30 }
 0x75c   : > { %p3354_p1 = scmp.lt.s32.totalorder %s3352_s25, %s3346_s23 }
 0x75e   : > { %p3355_p2 = por %p3354_p1, %p3353_p0 }
 0x760   : > { %p3356_p3 = pnand %p3355_p2, %p3349_p13 }
 0x762   : > { %v1741_v41 = vpop.xlane.xlu0 %1740 }
 0x763   : > { %v1743_v44 = vsub.f32 %v1733_v12, %v1741_v41 }
 0x765   : > { %v1746_v48 = vmul.f32 1.442695, %v1743_v44 }
 0x77e   : > { %1737 = vmax.xlane.f32.xlu1 %v1736_v54 }
 0x7c6   : > { %v1827_v26 = vpop.xlane.xlu1 %1826 }
 0x7c7   : > { %3310 = vrcp.f32 %v1827_v26  ;;  %v1657_v26 = vpop.f32.mrf.mxu1 }
 0x7ca   : > { %v1830_v27 = vpop.xlane.xlu1 %1829 }
 0x7cb   : > { %3312 = vrcp.f32 %v1830_v27 }
 0x7ce   : > { %v1928_v31 = vpop.permute.xlu1 %1927 }
 0x7cf   : > { %v1933_v33 = vsel %vm1688_vm2, %v1928_v31, 0 }
 0x7d2   : > { %v2049_v34 = vpop.permute.xlu1 %2048 }
 0x7d3   : > { %v2054_v37 = vsel %vm1688_vm2, %v2049_v34, 0 }
 0x7d4   : > { %v3311_v35 = vpop.eup %3310 }
 0x7d5   : > { %v1833_v29 = vmul.f32 %v3311_v35, %v3307_v20 }
 0x7d6   : > { %v2047_v38 = vpop.permute.xlu1 %2046 }
 0x7d8   : > { %v3313_v28 = vpop.eup %3312 }
 0x7d9   : > { %v1834_v30 = vmul.f32 %v3313_v28, %v3309_v24  ;;  %v1659_v28 = vpop.f32.mrf.mxu1 }
 0x7db   : > { %v1835_v32 = vpack.c.bf16 %v1834_v30, %v1833_v29 }
 0x7dd   : > { %2993 = vmatmul.mubr.msk.bf16.vlgmr.msra.gmra.mxu0 %vm1075_vm1, %v1835_v32 }
 0x7de   : > { %3003 = vmatpush3.bf16.xpose.msra.mxu0 %v1933_v33  ;;  %3004 = vmatprep.mubr.msk.bf16.mxu0 %vm3410_vm0, %v3409_v8  ;;  %v1661_v33 = vpop.f32.mrf.mxu1 }
 0x7df   : > { %3014 = vmatprep.subr.bf16.mxu0 %v3409_v8 }
 0x7e5   : > { %3005 = vmatmul.mubr.msk.bf16.vlgmr.msra.gmra.mxu0 %vm1688_vm2, %v1926_v36 }
 0x7e6   : > { %3015 = vmatpush3.bf16.xpose.msra.mxu0 %v2054_v37  ;;  %3016 = vmatprep.mubr.msk.bf16.mxu0 %vm3410_vm0, %v3409_v8 }
 0x7e7   : > { %3026 = vmatprep.subr.bf16.mxu0 %v3409_v8 }
 0x7ed   : > { %3017 = vmatmul.mubr.msk.bf16.vlgmr.msra.gmra.mxu0 %vm1688_vm2, %v2047_v38  ;;  %v1999_v38 = vpack.c.bf16 %v1661_v33, %v1657_v26  ;;  %v3277_v26 = vld [vmem:[%s4181_s14 + $0x60] ss:$12 sps:$4 sm:$0xff]   ;;  %v3285_v33 = vld [vmem:[%s4181_s14 + $0x64] ss:$12 sps:$4 sm:$0xff]  }
 0x7ee   : > { %3042 = vmatprep.mubr.msk.bf16.mxu0 %vm3410_vm0, %v3409_v8 }
 0x807   : > { %v1738_v39 = vpop.xlane.xlu1 %1737 }
 0x808   : > { %v1742_v40 = vsub.f32 %v1730_v53, %v1738_v39 }
 0x80a   : > { %v1744_v45 = vmul.f32 1.442695, %v1742_v40 }
 0x80c   : > { %3314 = vpow2.f32 %v1744_v45 }
 0x80d   : > { %3316 = vpow2.f32 %v1746_v48 }
 0x819   : > { %v3315_v63 = vpop.eup %3314 }
 0x81a   : > { %v1748_v4 = vsel %vm1075_vm1, %v3315_v63, 0.0  ;;  %v3317_v7 = vpop.eup %3316 }
 0x81b   : > { %v1751_v9 = vsel %vm1075_vm1, %v3317_v7, 0.0 }
 0x89d   : > { %v3961_v42 = vpop.f32.mrf.mxu0 }
 0x89f   : > { %v2994_v43 = vpop.f32.mrf.mxu0 }
 0x8a1   : > { %v3963_v46 = vpop.f32.mrf.mxu0 }
 0x8a3   : > { %v2995_v47 = vpop.f32.mrf.mxu0 }
 0x8a4   : > { %v1663_v47 = vpop.f32.mrf.mxu1 }
 0x8a5   : > { %v1969_v49 = vpop.f32.mrf.mxu0 }
 0x8a6   : > { %v1970_v50 = vadd.f32 %v1969_v49, %v3931_v1 }
 0x8a7   : > { %v3006_v51 = vpop.f32.mrf.mxu0 }
 0x8a8   : > { %v1976_v52 = vsel %vm1075_vm1, %v1970_v50, -inf  ;;  %v2120_v51 = vpack.c.bf16 %v1663_v47, %v1659_v28  ;;  %v3280_v28 = vld [vmem:[%s4181_s14 + $0x18] ss:$12 sps:$4 sm:$0xff]  }
 0x8a9   : > { %1977 = vmax.xlane.f32.xlu0 %v1976_v52  ;;  %v1972_v55 = vpop.f32.mrf.mxu0 }
 0x8aa   : > { %v1973_v56 = vadd.f32 %v1972_v55, %v3938_v6 }
 0x8ab   : > { %v3007_v57 = vpop.f32.mrf.mxu0 }
 0x8ac   : > { %v1979_v58 = vsel %vm1075_vm1, %v1973_v56, -inf }
 0x8ad   : > { %1980 = vmax.xlane.f32.xlu1 %v1979_v58  ;;  %v2090_v59 = vpop.f32.mrf.mxu0 }
 0x8ae   : > { %v2091_v60 = vadd.f32 %v2090_v59, %v3931_v1 }
 0x8af   : > { %v3018_v61 = vpop.f32.mrf.mxu0 }
 0x8b0   : > { %v2097_v62 = vsel %vm1075_vm1, %v2091_v60, -inf }
 0x8b1   : > { %2098 = vmax.xlane.f32.xlu0 %v2097_v62  ;;  %v2093_v0 = vpop.f32.mrf.mxu0 }
 0x8b2   : > { %v2094_v2 = vadd.f32 %v2093_v0, %v3938_v6 }
 0x8b3   : > { %v3019_v3 = vpop.f32.mrf.mxu0 }
 0x8b4   : > { %v2100_v5 = vsel %vm1075_vm1, %v2094_v2, -inf }
 0x8b5   : > { %1749 = vadd.xlane.f32.xlu0 %v1748_v4  ;;  %2101 = vmax.xlane.f32.xlu1 %v2100_v5 }
 0x8b9   : > { %1752 = vadd.xlane.f32.xlu1 %v1751_v9  ;;  %v2834_v9 = vld [vmem:[%s4182_s15] ss:$0 sm:$0xff] }
 0x932   : > { %v1978_v1 = vpop.xlane.xlu0 %1977 }
 0x933   : > { %v1982_v10 = vsub.f32 %v1970_v50, %v1978_v1 }
 0x935   : > { %v1984_v11 = vmul.f32 1.442695, %v1982_v10 }
 0x936   : > { %v1981_v12 = vpop.xlane.xlu1 %1980 }
 0x937   : > { %3318 = vpow2.f32 %v1984_v11  ;;  %v1983_v13 = vsub.f32 %v1973_v56, %v1981_v12 }
 0x939   : > { %v1986_v14 = vmul.f32 1.442695, %v1983_v13 }
 0x93a   : > { %v2099_v15 = vpop.xlane.xlu0 %2098 }
 0x93b   : > { %3320 = vpow2.f32 %v1986_v14  ;;  %v2103_v6 = vsub.f32 %v2091_v60, %v2099_v15 }
 0x93d   : > { %v2105_v16 = vmul.f32 1.442695, %v2103_v6 }
 0x93e   : > { %v2102_v17 = vpop.xlane.xlu1 %2101  ;;  %v1750_v18 = vpop.xlane.xlu0 %1749 }
 0x93f   : > { %3322 = vpow2.f32 %v2105_v16  ;;  %v2104_v19 = vsub.f32 %v2094_v2, %v2102_v17 }
 0x940   : > { %3324 = vrcp.f32 %v1750_v18  ;;  %v3274_v18 = vld [vmem:[%s4181_s14 + $0xa8] ss:$12 sps:$4 sm:$0xff]  }
 0x941   : > { %v2107_v20 = vmul.f32 1.442695, %v2104_v19  ;;  %3027 = vmatpush3.bf16.msra.mxu0 %v3274_v18 }
 0x942   : > { %v1753_v23 = vpop.xlane.xlu1 %1752  ;;  %3028 = vmatprep.subr.bf16.mxu0 %v3409_v8 }
 0x943   : > { %3326 = vpow2.f32 %v2107_v20 }
 0x944   : > { %v3319_v24 = vpop.eup %3318  ;;  %3328 = vrcp.f32 %v1753_v23 }
 0x945   : > { %v1988_v25 = vsel %vm1075_vm1, %v3319_v24, 0.0 }
 0x946   : > { %1989 = vadd.xlane.f32.xlu0 %v1988_v25 }
 0x948   : > { %v3321_v53 = vpop.eup %3320 }
 0x949   : > { %v1991_v54 = vsel %vm1075_vm1, %v3321_v53, 0.0 }
 0x94a   : > { %1992 = vadd.xlane.f32.xlu1 %v1991_v54  ;;  %v3276_v54 = vld [vmem:[%s4181_s14 + $0x78] ss:$12 sps:$4 sm:$0xff]  }
 0x94c   : > { %v3323_v27 = vpop.eup %3322 }
 0x94d   : > { %v2109_v35 = vsel %vm1075_vm1, %v3323_v27, 0.0  ;;  %v3325_v29 = vpop.eup %3324 }
 0x94e   : > { %2110 = vadd.xlane.f32.xlu0 %v2109_v35  ;;  %v1756_v34 = vmul.f32 %v3325_v29, %v3315_v63  ;;  %v3279_v35 = vld [vmem:[%s4181_s14 + $0x30] ss:$12 sps:$4 sm:$0xff]   ;;  %v3281_v29 = vld [vmem:[%s4181_s14] ss:$12 sps:$4 sm:$0xff]  }
 0x950   : > { %v3327_v30 = vpop.eup %3326 }
 0x951   : > { %v3329_v31 = vpop.eup %3328  ;;  %v2112_v32 = vsel %vm1075_vm1, %v3327_v30, 0.0 }
 0x952   : > { %2113 = vadd.xlane.f32.xlu1 %v2112_v32  ;;  %v1757_v36 = vmul.f32 %v3329_v31, %v3317_v7  ;;  %v3283_v31 = vld [vmem:[%s4181_s14 + $0x94] ss:$12 sps:$4 sm:$0xff]   ;;  %v3284_v32 = vld [vmem:[%s4181_s14 + $0x7c] ss:$12 sps:$4 sm:$0xff]  }
 0x954   : > { %v1758_v37 = vpack.c.bf16 %v1757_v36, %v1756_v34  ;;  %v3286_v34 = vld [vmem:[%s4181_s14 + $0x4c] ss:$12 sps:$4 sm:$0xff]  }
 0x956   : > { %2999 = vmatmul.mubr.msk.bf16.vlgmr.msra.gmra.mxu1 %vm1075_vm1, %v1758_v37 }
 0x957   : > { %3009 = vmatpush3.bf16.msra.mxu1 %v1999_v38  ;;  %3010 = vmatprep.mubr.msk.bf16.mxu1 %vm3410_vm0, %v3409_v8 }
 0x958   : > { %3020 = vmatprep.subr.bf16.mxu1 %v3409_v8 }
 0x9cf   : > { %v1990_v39 = vpop.xlane.xlu0 %1989 }
 0x9d0   : > { %3330 = vrcp.f32 %v1990_v39 }
 0x9d3   : > { %v1993_v40 = vpop.xlane.xlu1 %1992 }
 0x9d4   : > { %3332 = vrcp.f32 %v1993_v40 }
 0x9d7   : > { %v2111_v41 = vpop.xlane.xlu0 %2110 }
 0x9d8   : > { %3334 = vrcp.f32 %v2111_v41 }
 0x9db   : > { %v2114_v43 = vpop.xlane.xlu1 %2113 }
 0x9dc   : > { %3336 = vrcp.f32 %v2114_v43 }
 0x9dd   : > { %v3331_v44 = vpop.eup %3330 }
 0x9de   : > { %v1996_v48 = vmul.f32 %v3331_v44, %v3319_v24 }
 0x9e1   : > { %v3333_v45 = vpop.eup %3332 }
 0x9e2   : > { %v1997_v49 = vmul.f32 %v3333_v45, %v3321_v53  ;;  %v2835_v45 = vld [vmem:[%s4183_s16] ss:$0 sm:$0xff] }
 0x9e4   : > { %v1998_v50 = vpack.c.bf16 %v1997_v49, %v1996_v48 }
 0x9e5   : > { %v3335_v52 = vpop.eup %3334 }
 0x9e6   : > { %3011 = vmatmul.mubr.msk.bf16.vlgmr.msra.gmra.mxu1 %vm1075_vm1, %v1998_v50  ;;  %v2117_v56 = vmul.f32 %v3335_v52, %v3323_v27  ;;  %v3278_v27 = vld [vmem:[%s4181_s14 + $0x48] ss:$12 sps:$4 sm:$0xff]   ;;  %v2836_v50 = vld [vmem:[%s4183_s16 + $0x1] ss:$0 sm:$0xff] }
 0x9e7   : > { %3021 = vmatpush3.bf16.msra.mxu1 %v2120_v51  ;;  %3022 = vmatprep.mubr.msk.bf16.mxu1 %vm3410_vm0, %v3409_v8 }
 0x9e8   : > { %3046 = vmatprep.subr.bf16.mxu1 %v3409_v8 }
 0x9e9   : > { %v3337_v55 = vpop.eup %3336 }
 0x9ea   : > { %v2118_v57 = vmul.f32 %v3337_v55, %v3327_v30  ;;  %v3282_v30 = vld [vmem:[%s4181_s14 + $0xac] ss:$12 sps:$4 sm:$0xff]  }
 0x9ec   : > { %v2119_v58 = vpack.c.bf16 %v2118_v57, %v2117_v56  ;;  %v3287_v57 = vld [vmem:[%s4181_s14 + $0x34] ss:$12 sps:$4 sm:$0xff]  }
 0x9ee   : > { %3023 = vmatmul.mubr.msk.bf16.vlgmr.msra.gmra.mxu1 %vm1075_vm1, %v2119_v58  ;;  %v3288_v58 = vld [vmem:[%s4181_s14 + $0x1c] ss:$12 sps:$4 sm:$0xff]  }
 0x9ef   : > { %3062 = vmatprep.mubr.msk.bf16.mxu1 %vm3410_vm0, %v3409_v8  ;;  %3047 = vmatpush3.bf16.msra.mxu1 %v3282_v30 }
 0x9f0   : > { %3048 = vmatprep.subr.bf16.mxu1 %v3409_v8 }
 0x9f3   : > { %3049 = vmatpush3.bf16.msra.mxu1 %v3283_v31 }
 0x9f4   : > { %3050 = vmatprep.subr.bf16.mxu1 %v3409_v8 }
 0x9f7   : > { %3051 = vmatpush3.bf16.msra.mxu1 %v3284_v32 }
 0x9f8   : > { %3052 = vmatprep.subr.bf16.mxu1 %v3409_v8 }
 0x9fb   : > { %3053 = vmatpush3.bf16.msra.mxu1 %v3285_v33 }
 0x9fc   : > { %3054 = vmatprep.subr.bf16.mxu1 %v3409_v8 }
 0x9ff   : > { %3055 = vmatpush3.bf16.msra.mxu1 %v3286_v34  ;;  %v2855_v34 = vld [vmem:[%s4183_s16 + $0x2] ss:$0 sm:$0xff] }
 0xa00   : > { %3056 = vmatprep.subr.bf16.mxu1 %v3409_v8 }
 0xa03   : > { %3057 = vmatpush3.bf16.msra.mxu1 %v3287_v57 }
 0xa04   : > { %3058 = vmatprep.subr.bf16.mxu1 %v3409_v8 }
 0xa07   : > { %3059 = vmatpush3.bf16.msra.mxu1 %v3288_v58 }
 0xa08   : > { %3060 = vmatprep.subr.bf16.mxu1 %v3409_v8 }
 0xa16   : > { %v1918_v59 = vpop.f32.mrf.mxu1 }
 0xa17   : > { %v1919_v3 = vadd.f32 %v1918_v59, %v3961_v42  ;;  %v3289_v59 = vld [vmem:[%s4181_s14 + $0x4] ss:$12 sps:$4 sm:$0xff]  }
 0xa18   : > { %v3000_v60 = vpop.f32.mrf.mxu1  ;;  %3061 = vmatpush3.bf16.msra.mxu1 %v3289_v59 }
 0xa19   : > { %3072 = vmatprep.subr.bf16.mxu1 %v3409_v8  ;;  %v2837_v60 = vld [vmem:[%s4182_s15 + $0x1] ss:$0 sm:$0xff] }
 0xa1a   : > { %v1921_v61 = vpop.f32.mrf.mxu1 }
 0xa1b   : > { %v1922_v1 = vadd.f32 %v1921_v61, %v3963_v46 }
 0xa1c   : > { %v3001_v62 = vpop.f32.mrf.mxu1 }
 0xaa6   : > { %v2037_v63 = vpop.f32.mrf.mxu1 }
 0xaa7   : > { %v2044_v5 = vadd.f32 %v2037_v63, %v1919_v3 }
 0xaa8   : > { %v3012_v0 = vpop.f32.mrf.mxu1 }
 0xaaa   : > { %v2040_v2 = vpop.f32.mrf.mxu1 }
 0xaab   : > { %v2045_v12 = vadd.f32 %v2040_v2, %v1922_v1 }
 0xaac   : > { %v3013_v4 = vpop.f32.mrf.mxu1 }
 0xaae   : > { %v2158_v7 = vpop.f32.mrf.mxu1 }
 0xaaf   : > { %v2165_v10 = vadd.f32 %v2158_v7, %v2044_v5 }
 0xab0   : > { %v3024_v11 = vpop.f32.mrf.mxu1 }
 0xab1   : > { %v2174_v13 = vadd.f32 %v2834_v9, %v2165_v10 }
 0xab2   : > { %v2161_v14 = vpop.f32.mrf.mxu1 }
 0xab3   : > { %v2166_v15 = vadd.f32 %v2161_v14, %v2045_v12  ;;  %v2176_v6 = vadd.f32 %v2174_v13, %v3853_v21 }
 0xab4   : > { %v3025_v16 = vpop.f32.mrf.mxu1 }
 0xab5   : > { %v2175_v17 = vadd.f32 %v2834_v9, %v2166_v15  ;;  %2182 = vadd.xlane.f32.xlu0 %v2176_v6  ;;  %v2846_v9 = vld [vmem:[%s4182_s15 + $0x2] ss:$0 sm:$0xff] }
 0xab7   : > { %v2177_v42 = vadd.f32 %v2175_v17, %v3855_v22  ;;  %v3275_v22 = vld [vmem:[%s4181_s14 + $0x90] ss:$12 sps:$4 sm:$0xff]  }
 0xab8   : > { %3029 = vmatpush3.bf16.msra.mxu0 %v3275_v22  ;;  %v3294_v22 = vld [vmem:[%s4181_s14 + $0x50] ss:$12 sps:$4 sm:$0xff]  }
 0xab9   : > { %2184 = vadd.xlane.f32.xlu1 %v2177_v42  ;;  %3030 = vmatprep.subr.bf16.mxu0 %v3409_v8 }
 0xabc   : > { %3031 = vmatpush3.bf16.msra.mxu0 %v3276_v54  ;;  %v3295_v54 = vld [vmem:[%s4181_s14 + $0x38] ss:$12 sps:$4 sm:$0xff]  }
 0xabd   : > { %3032 = vmatprep.subr.bf16.mxu0 %v3409_v8 }
 0xac0   : > { %3033 = vmatpush3.bf16.msra.mxu0 %v3277_v26  ;;  %v3296_v26 = vld [vmem:[%s4181_s14 + $0x20] ss:$12 sps:$4 sm:$0xff]  }
 0xac1   : > { %3034 = vmatprep.subr.bf16.mxu0 %v3409_v8 }
 0xac4   : > { %3035 = vmatpush3.bf16.msra.mxu0 %v3278_v27 }
 0xac5   : > { %3036 = vmatprep.subr.bf16.mxu0 %v3409_v8 }
 0xac8   : > { %3037 = vmatpush3.bf16.msra.mxu0 %v3279_v35 }
 0xac9   : > { %3038 = vmatprep.subr.bf16.mxu0 %v3409_v8 }
 0xacc   : > { %3039 = vmatpush3.bf16.msra.mxu0 %v3280_v28 }
 0xacd   : > { %3040 = vmatprep.subr.bf16.mxu0 %v3409_v8 }
 0xad0   : > { %3041 = vmatpush3.bf16.msra.mxu0 %v3281_v29 }
 0xad1   : > { %3066 = vmatprep.subr.bf16.mxu0 %v3409_v8 }
 0xb3e   : > { %v2183_v46 = vpop.xlane.xlu0 %2182 }
 0xb3f   : > { %v2187_v19 = vmul.f32 0.0078125, %v2183_v46 }
 0xb41   : > { %v2189_v20 = vsub.f32 %v2176_v6, %v2187_v19 }
 0xb42   : > { %v2185_v23 = vpop.xlane.xlu1 %2184 }
 0xb43   : > { %v2188_v24 = vmul.f32 0.0078125, %v2185_v23  ;;  %v2191_v25 = vmul.f32 %v2189_v20, %v2189_v20 }
 0xb45   : > { %v2190_v21 = vsub.f32 %v2177_v42, %v2188_v24  ;;  %2193 = vadd.xlane.f32.xlu0 %v2191_v25  ;;  %v3290_v24 = vld [vmem:[%s4181_s14 + $0xb0] ss:$12 sps:$4 sm:$0xff]   ;;  %v3291_v25 = vld [vmem:[%s4181_s14 + $0x98] ss:$12 sps:$4 sm:$0xff]  }
 0xb47   : > { %v2192_v53 = vmul.f32 %v2190_v21, %v2190_v21 }
 0xb49   : > { %2195 = vadd.xlane.f32.xlu1 %v2192_v53  ;;  %v3293_v53 = vld [vmem:[%s4181_s14 + $0x68] ss:$12 sps:$4 sm:$0xff]  }
 0xbce   : > { %v2194_v36 = vpop.xlane.xlu0 %2193 }
 0xbcf   : > { %v2197_v37 = vmul.f32 0.0078125, %v2194_v36 }
 0xbd1   : > { %v2199_v38 = vadd.f32 1e-05, %v2197_v37 }
 0xbd2   : > { %v2196_v39 = vpop.xlane.xlu1 %2195 }
 0xbd3   : > { %3338 = vrsqrt.f32 %v2199_v38  ;;  %v2198_v40 = vmul.f32 0.0078125, %v2196_v39 }
 0xbd5   : > { %v2200_v41 = vadd.f32 1e-05, %v2198_v40 }
 0xbd7   : > { %3340 = vrsqrt.f32 %v2200_v41 }
 0xbe0   : > { %v3339_v43 = vpop.eup %3338 }
 0xbe1   : > { %v2203_v44 = vmul.f32 %v3339_v43, %v2189_v20 }
 0xbe3   : > { %v2211_v49 = vmul.f32 %v2835_v45, %v2203_v44  ;;  %v2489_v44 = vld [vmem:[%s4174_s7] sm:$0x1] }
 0xbe4   : > { %v3341_v47 = vpop.eup %3340 }
 0xbe5   : > { %v2204_v48 = vmul.f32 %v3341_v47, %v2190_v21  ;;  %v2219_v52 = vadd.f32 %v2836_v50, %v2211_v49  ;;  %v3292_v21 = vld [vmem:[%s4181_s14 + $0x80] ss:$12 sps:$4 sm:$0xff]  }
 0xbe7   : > { %v2212_v51 = vmul.f32 %v2835_v45, %v2204_v48  ;;  %v3297_v45 = vld [vmem:[%s4181_s14 + $0x8] ss:$12 sps:$4 sm:$0xff]  }
 0xbe9   : > { %v2220_v55 = vadd.f32 %v2836_v50, %v2212_v51 }
 0xbeb   : > { %v2221_v56 = vpack.c.bf16 %v2220_v55, %v2219_v52 }
 0xbed   : > { %3043 = vmatmul.mubr.bf16.vlgmr.msra.gmra.mxu0 %v2221_v56 }
 0xbee   : > { %3068 = vmatprep.mubr.msk.bf16.mxu0 %vm3410_vm0, %v3409_v8 }
 0xcad   : > { %v2327_v61 = vpop.f32.mrf.mxu0 }
 0xcae   : > { %v2328_v63 = vadd.f32 %v2837_v60, %v2327_v61 }
 0xcaf   : > { %v3044_v62 = vpop.f32.mrf.mxu0 }
 0xcb0   : > { %v2334_v4 = vmax.f32 %v2328_v63, 0.0 }
 0xcb1   : > { %v2330_v0 = vpop.f32.mrf.mxu0 }
 0xcb2   : > { %v2331_v2 = vadd.f32 %v2837_v60, %v2330_v0 }
 0xcb3   : > { %v3045_v3 = vpop.f32.mrf.mxu0 }
 0xcb4   : > { %v2335_v5 = vmax.f32 %v2331_v2, 0.0 }
 0xcb6   : > { %v2336_v7 = vpack.c.bf16 %v2335_v5, %v2334_v4 }
 0xcb8   : > { %3063 = vmatmul.mubr.bf16.vlgmr.msra.gmra.mxu1 %v2336_v7 }
 0xcb9   : > { %3088 = vmatprep.mubr.msk.bf16.mxu1 %vm3410_vm0, %v3409_v8  ;;  %3073 = vmatpush3.bf16.msra.mxu1 %v3290_v24 }
 0xcba   : > { %3074 = vmatprep.subr.bf16.mxu1 %v3409_v8 }
 0xcbd   : > { %3075 = vmatpush3.bf16.msra.mxu1 %v3291_v25 }
 0xcbe   : > { %3076 = vmatprep.subr.bf16.mxu1 %v3409_v8 }
 0xcc1   : > { %3077 = vmatpush3.bf16.msra.mxu1 %v3292_v21 }
 0xcc2   : > { %3078 = vmatprep.subr.bf16.mxu1 %v3409_v8 }
 0xcc5   : > { %3079 = vmatpush3.bf16.msra.mxu1 %v3293_v53 }
 0xcc6   : > { %3080 = vmatprep.subr.bf16.mxu1 %v3409_v8 }
 0xcc9   : > { %3081 = vmatpush3.bf16.msra.mxu1 %v3294_v22 }
 0xcca   : > { %3082 = vmatprep.subr.bf16.mxu1 %v3409_v8 }
 0xccd   : > { %3083 = vmatpush3.bf16.msra.mxu1 %v3295_v54 }
 0xcce   : > { %3084 = vmatprep.subr.bf16.mxu1 %v3409_v8 }
 0xcd1   : > { %3085 = vmatpush3.bf16.msra.mxu1 %v3296_v26 }
 0xcd2   : > { %3086 = vmatprep.subr.bf16.mxu1 %v3409_v8  ;;  %v2856_v8 = vld [vmem:[%s4183_s16 + $0x3] ss:$0 sm:$0xff] }
 0xcd5   : > { %3087 = vmatpush3.bf16.msra.mxu1 %v3297_v45 }
 0xd78   : > { %v2442_v1 = vpop.f32.mrf.mxu1 }
 0xd79   : > { %v2443_v10 = vadd.f32 %v2846_v9, %v2442_v1 }
 0xd7a   : > { %v3064_v11 = vpop.f32.mrf.mxu1 }
 0xd7b   : > { %v2449_v12 = vadd.f32 %v2443_v10, %v2219_v52  ;;  %v2551_v52 = vld [vmem:[%s4182_s15 + $0x3] sm:$0x1] }
 0xd7c   : > { %v2445_v13 = vpop.f32.mrf.mxu1 }
 0xd7d   : > { %v2446_v14 = vadd.f32 %v2846_v9, %v2445_v13  ;;  %2451 = vadd.xlane.f32.xlu0 %v2449_v12 }
 0xd7e   : > { %v3065_v15 = vpop.f32.mrf.mxu1 }
 0xd7f   : > { %v2450_v6 = vadd.f32 %v2446_v14, %v2220_v55 }
 0xd81   : > { %2453 = vadd.xlane.f32.xlu1 %v2450_v6 }
 0xe06   : > { %v2452_v16 = vpop.xlane.xlu0 %2451 }
 0xe07   : > { %v2455_v17 = vmul.f32 0.0078125, %v2452_v16 }
 0xe09   : > { %v2457_v42 = vsub.f32 %v2449_v12, %v2455_v17 }
 0xe0a   : > { %v2454_v18 = vpop.xlane.xlu1 %2453 }
 0xe0b   : > { %v2456_v46 = vmul.f32 0.0078125, %v2454_v18  ;;  %v2459_v19 = vmul.f32 %v2457_v42, %v2457_v42 }
 0xe0d   : > { %v2458_v20 = vsub.f32 %v2450_v6, %v2456_v46  ;;  %2461 = vadd.xlane.f32.xlu0 %v2459_v19 }
 0xe0f   : > { %v2460_v23 = vmul.f32 %v2458_v20, %v2458_v20 }
 0xe11   : > { %2463 = vadd.xlane.f32.xlu1 %v2460_v23 }
 0xe96   : > { %v2462_v27 = vpop.xlane.xlu0 %2461 }
 0xe97   : > { %v2465_v35 = vmul.f32 0.0078125, %v2462_v27 }
 0xe99   : > { %v2467_v28 = vadd.f32 1e-05, %v2465_v35 }
 0xe9a   : > { %v2464_v29 = vpop.xlane.xlu1 %2463 }
 0xe9b   : > { %3342 = vrsqrt.f32 %v2467_v28  ;;  %v2466_v30 = vmul.f32 0.0078125, %v2464_v29 }
 0xe9d   : > { %v2468_v31 = vadd.f32 1e-05, %v2466_v30 }
 0xe9f   : > { %3344 = vrsqrt.f32 %v2468_v31 }
 0xea8   : > { %v3343_v32 = vpop.eup %3342 }
 0xea9   : > { %v2471_v33 = vmul.f32 %v3343_v32, %v2457_v42 }
 0xeab   : > { %v2479_v38 = vmul.f32 %v2855_v34, %v2471_v33 }
 0xeac   : > { %v3345_v36 = vpop.eup %3344 }
 0xead   : > { %v2472_v37 = vmul.f32 %v3345_v36, %v2458_v20  ;;  %v2487_v40 = vadd.f32 %v2856_v8, %v2479_v38 }
 0xeaf   : > { %v2480_v39 = vmul.f32 %v2855_v34, %v2472_v37 }
 0xeb1   : > { %v2488_v41 = vadd.f32 %v2856_v8, %v2480_v39 }
 0xeb3   : > { %v2490_v43 = vpack.c.bf16 %v2488_v41, %v2487_v40 }
 0xeb5   : > { %3067 = vmatpush3.bf16.msra.mxu0 %v2490_v43 }
 0xeb8   : > { %3069 = vmatmul.mubr.msk.bf16.vlgmr.msra.gmra.mxu0 %vm1075_vm1, %v2489_v44 }
 0xf78   : > { %v2528_v47 = vpop.f32.mrf.mxu0 }
 0xf79   : > { %v2534_v48 = vpack.c.bf16 %v2528_v47, %v2528_v47 }
 0xf7a   : > { %v3070_v49 = vpop.f32.mrf.mxu0 }
 0xf7b   : > { %3089 = vmatmul.mubr.bf16.vlgmr.msra.gmra.mxu1 %v2534_v48 }
 0xf7c   : > { %v2531_v50 = vpop.f32.mrf.mxu0 }
 0xf7e   : > { %v3071_v51 = vpop.f32.mrf.mxu0 }
0x103b   : > { %v2634_v55 = vpop.f32.mrf.mxu1 }
0x103c   : > { %v2635_v56 = vadd.f32 %v2634_v55, %v2551_v52 }
0x103d   : > { %v3090_v57 = vpop.f32.mrf.mxu1 }
0x103e   : > { %2640 = vst [vmem:[%s545_s18] sm:$0x1] %v2635_v56 }
0x103f   : > { %v2637_v58 = vpop.f32.mrf.mxu1 }
0x1040   : > { %3359 = shalt.err (!%p3356_p3)
}
0x1041   : > { %s3360_s0 = scalar_lea.hbm %s4126_s24, 16  ;;  %s3364_s26 = scalar_lea.hbm %s4184_s17, 32 }
0x1042   : > { %p3361_p4 = scmp.ne.s32.totalorder %s4126_s24, %s3360_s0  ;;  %p3365_p9 = scmp.lt.s32.totalorder %s4126_s24, %s4184_s17 }
0x1043   : > { %p3366_p10 = scmp.lt.s32.totalorder %s3364_s26, %s3360_s0 }
0x1044   : > { %p3362_p7 = pnand %p3361_p4, %p3546_p5 }
0x1045   : > { %p3367_p11 = por %p3366_p10, %p3365_p9 }
0x1046   : > { %p3363_p8 = pneg %p3362_p7 }
0x1048   : > { %p3368_p12 = pnand %p3367_p11, %p3363_p8 }
0x104a   : > { %3371 = shalt.err (!%p3368_p12)
}
0x104b   : > { %3092 = dma.vmem_to_hbm [thread:$0]  (%p3546_p5), %s4128_s28, 16, %s4126_s24, %s2642_s22   ;;  %v3091_v59 = vpop.f32.mrf.mxu1 }
0x104c PF: > { %s4202_s23 = sld [smem:[#allocation6_spill]]  ;;  %p3098_p13 = scmp.ge.s32.totalorder %s3406_s29, 2 }
0x104e   : > { %p3095_p0 = pnand %p3098_p13, %p3550_p6 }
0x1050   : > { %p3096_p1 = pneg %p3095_p0 }
0x1052   : > { %s2666_s25 = sand.u32 1, %s4202_s23  }
0x1053   : > { %s2667_s21 = scalar_lea.sflag [#allocation4], %s2666_s25 }
0x1054   : > { %3389 = dma.done.wait (%p3096_p1), %s2667_s21, 16  }
0x1055   : > { %3391 = vsyncadd (%p3096_p1), %s2667_s21, 4294967280  ;;  %s4204_s29 = sld [smem:[#allocation8_spill]]  ;;  %s4207_s26 = smov %s3398_s27 }
0x1056   : > { %s4205_s0 = sld [smem:[#allocation7_spill]] }
0x1057   : > { %s4206_s28 = sld [smem:[#allocation9_spill]] }
0x105b   : > { %p29_p2 = scmp.ge.s32.totalorder %s4204_s29, 4  }
0x105c   : > { %s4208_s27 = smov %s4205_s0 }
0x105d   :  { %31 = sbr.rel (!%p29_p2) target bundleno = 6 (0x6), region = 123 }
0x1062   :  { %2671 = vsyncpa [#allocation4], 1 }
0x1063   :  { %2673 = vsyncpa [#allocation4 + $0x1], 1 }

</bundles_post_ra>
